<compile_context>
chip_gen: v7x
topology: tpu7x:2x2x1
jax: 0.10.0
libtpu: 0.0.40
codegen_flags: <defaults>
</compile_context>

<pallas_src>
import jax
import jax.numpy as jnp
import numpy as np
from jax import lax
from jax.experimental import pallas as pl
from jax.experimental.pallas import tpu as pltpu


def ques_embedding_kernel(x_ref, wih0_ref, whh0_ref, wih1_ref, whh1_ref,
                          b1_ref, wfc_ref, bfc_ref, out_ref):
    Bt = out_ref.shape[0]                  # batch-tile rows (multiple of 8)
    TB = x_ref.shape[0]                    # T * Bt (time-major within the tile)
    T = TB // Bt
    H = whh0_ref.shape[0]

    # ---- hoisted, loop-invariant work --------------------------------------
    # Layer-0 input projection for ALL time steps in one MXU op; b0 is folded in via
    # the ones column appended to x / bias row appended to wih0 in the wrapper.
    xg_all = jnp.dot(x_ref[...], wih0_ref[...],
                     preferred_element_type=jnp.float32)        # (T*Bt, 4H)

    whh0 = whh0_ref[...]                                        # (H, 4H)
    wih1 = wih1_ref[...]                                        # (H, 4H)
    whh1 = whh1_ref[...]                                        # (H, 4H)
    b1 = jnp.broadcast_to(b1_ref[...], (Bt, 4 * H))             # hoisted broadcast

    def gates_to_hc(gates, c_prev):
        # Full-width EUP ops (gates is one (8,128)-tile wide), then slice.
        # PyTorch LSTM gate order: i, f, g, o.
        sig = jax.nn.sigmoid(gates)
        th = jnp.tanh(gates)
        i_g = sig[:, 0 * H:1 * H]
        f_g = sig[:, 1 * H:2 * H]
        g_g = th[:, 2 * H:3 * H]
        o_g = sig[:, 3 * H:4 * H]
        c_new = f_g * c_prev + i_g * g_g
        h_new = o_g * jnp.tanh(c_new)
        return h_new, c_new

    zeros = jnp.zeros((Bt, H), jnp.float32)
    h0, c0, h1, c1 = zeros, zeros, zeros, zeros

    # ---- recurrence: fully unrolled (T is small and static) -----------------
    # NOTE: padded batch rows compute garbage (sigmoid of biases etc.); rows are
    # independent and sliced off in the wrapper, so this is benign -- do NOT add a
    # batch reduction inside this kernel.
    for t in range(T):
        # Layer-1 recurrent dot depends only on h1_prev -> independent of layer 0;
        # the scheduler can overlap it with layer-0's EUP/VPU work.
        g1_rec = jnp.dot(h1, whh1, preferred_element_type=jnp.float32) + b1
        # Layer 0: precomputed input gates (sublane-aligned slice) + recurrent dot.
        g0 = xg_all[t * Bt:(t + 1) * Bt, :] + jnp.dot(
            h0, whh0, preferred_element_type=jnp.float32)
        h0, c0 = gates_to_hc(g0, c0)
        # Layer 1: input projection of the fresh h0 plus the precomputed recurrent part.
        g1 = g1_rec + jnp.dot(h0, wih1, preferred_element_type=jnp.float32)
        h1, c1 = gates_to_hc(g1, c1)

    # ---- finalize: ques_embedding = [h0, c0, h1, c1] -> Linear -> Tanh -------
    emb = jnp.concatenate([h0, c0, h1, c1], axis=1)             # (Bt, 4H)
    y = jnp.dot(emb, wfc_ref[...], preferred_element_type=jnp.float32) + bfc_ref[...]
    out_ref[...] = jnp.tanh(y)                                  # lane-dense (Bt, OUTp) store


def _round_up(n, m):
    return ((n + m - 1) // m) * m


def _pad_to(a, axis, target):
    pad = target - a.shape[axis]
    if pad <= 0:
        return a
    widths = [(0, 0)] * a.ndim
    widths[axis] = (0, pad)
    return jnp.pad(a, widths)


def ques_embedding(ques, params, *, btile=None):
    """ques: [B, T, I] float32 (batch_first, matching the PyTorch module)."""
    B, T, I = ques.shape
    H = params["whh0"].shape[0]
    OUT = params["wfc"].shape[1]

    SUB, LANE = 8, 128
    if btile is None:
        btile = min(128, _round_up(B, SUB))     # batch-tile rows per grid step
    btile = _round_up(btile, SUB)
    Bp = _round_up(B, btile)
    nb = Bp // btile
    OUTp = _round_up(OUT, LANE)                 # lane-dense fc output

    # Time-major, zero-pad batch, append a ones column (folds b0 into wih0).
    x_tm = jnp.transpose(ques, (1, 0, 2))                       # (T, B, I)
    x_tm = _pad_to(x_tm, 1, Bp)                                 # (T, Bp, I)
    ones = jnp.ones((T, Bp, 1), jnp.float32)
    x_aug = jnp.concatenate([x_tm, ones], axis=2)               # (T, Bp, I+1)
    # Batch-tile-major layout: within a tile rows are time-major flattened so the
    # kernel's per-step slice xg_all[t*btile:(t+1)*btile] is sublane-aligned.
    x_tiles = (x_aug.reshape(T, nb, btile, I + 1)
               .transpose(1, 0, 2, 3)
               .reshape(nb, T * btile, I + 1))

    wih0_aug = jnp.concatenate([params["wih0"], params["b0"]], axis=0)   # (I+1, 4H)
    wfc = _pad_to(params["wfc"], 1, OUTp)
    bfc = _pad_to(params["bfc"], 1, OUTp)

    def full(a):
        return pl.BlockSpec(a.shape, lambda b, _nd=a.ndim: (0,) * _nd)

    out = pl.pallas_call(
        ques_embedding_kernel,
        out_shape=jax.ShapeDtypeStruct((Bp, OUTp), jnp.float32),
        grid=(nb,),
        in_specs=[
            pl.BlockSpec((None, T * btile, I + 1), lambda b: (b, 0, 0)),
            full(wih0_aug), full(params["whh0"]), full(params["wih1"]),
            full(params["whh1"]), full(params["b1"]), full(wfc), full(bfc),
        ],
        out_specs=pl.BlockSpec((btile, OUTp), lambda b: (b, 0)),
        compiler_params=pltpu.CompilerParams(dimension_semantics=("parallel",)),
    )(x_tiles, wih0_aug, params["whh0"], params["wih1"],
      params["whh1"], params["b1"], wfc, bfc)
    return out[:B, :OUT]                          # drop zero padding


def ques_embedding_ref(ques, params):
    """Pure-JAX reference matching the PyTorch forward semantics."""
    B, T, I = ques.shape
    H = params["whh0"].shape[0]
    hi = lax.Precision.HIGHEST

    def cell(h, c, x_t, wih, whh, b):
        gates = (jnp.dot(x_t, wih, precision=hi)
                 + jnp.dot(h, whh, precision=hi) + b)
        i_g, f_g, g_g, o_g = jnp.split(gates, 4, axis=1)
        c = jax.nn.sigmoid(f_g) * c + jax.nn.sigmoid(i_g) * jnp.tanh(g_g)
        h = jax.nn.sigmoid(o_g) * jnp.tanh(c)
        return h, c

    def scan_fn(carry, x_t):
        (h0, c0), (h1, c1) = carry
        h0, c0 = cell(h0, c0, x_t, params["wih0"], params["whh0"], params["b0"])
        h1, c1 = cell(h1, c1, h0, params["wih1"], params["whh1"], params["b1"])
        return ((h0, c0), (h1, c1)), None

    z = jnp.zeros((B, H), jnp.float32)
    x_tm = jnp.transpose(ques, (1, 0, 2))
    ((h0, c0), (h1, c1)), _ = lax.scan(scan_fn, ((z, z), (z, z)), x_tm)
    emb = jnp.concatenate([h0, c0, h1, c1], axis=1)             # (B, 4H)
    return jnp.tanh(jnp.dot(emb, params["wfc"], precision=hi) + params["bfc"])


if __name__ == "__main__":
    # Small shapes consistent with the module (input_size=I, hidden_size=H,
    # output_size=OUT, num_layers=2, batch_first=True).
    B, T, I, H, OUT = 2, 8, 32, 32, 64

    key = jax.random.PRNGKey(0)
    ks = jax.random.split(key, 9)
    scale = 0.1
    params = {
        "wih0": scale * jax.random.normal(ks[0], (I, 4 * H), jnp.float32),
        "whh0": scale * jax.random.normal(ks[1], (H, 4 * H), jnp.float32),
        "b0":   scale * jax.random.normal(ks[2], (1, 4 * H), jnp.float32),
        "wih1": scale * jax.random.normal(ks[3], (H, 4 * H), jnp.float32),
        "whh1": scale * jax.random.normal(ks[4], (H, 4 * H), jnp.float32),
        "b1":   scale * jax.random.normal(ks[5], (1, 4 * H), jnp.float32),
        "wfc":  scale * jax.random.normal(ks[6], (4 * H, OUT), jnp.float32),
        "bfc":  scale * jax.random.normal(ks[7], (1, OUT), jnp.float32),
    }
    ques = jax.random.normal(ks[8], (B, T, I), jnp.float32)

    out = jax.block_until_ready(ques_embedding(ques, params))
    ref = jax.block_until_ready(ques_embedding_ref(ques, params))

    assert out.shape == (B, OUT), out.shape
    np.testing.assert_allclose(np.asarray(out), np.asarray(ref), atol=2e-5, rtol=1e-5)
    print("KERNEL_OK")
</pallas_src>

<mosaic_0001>
module attributes {stable_mosaic.version = 11 : i64} {
  func.func @ques_embedding_kernel(%arg0: i32, %arg1: memref<1x64x33xf32, #tpu.memory_space<vmem>>, %arg2: memref<33x128xf32, #tpu.memory_space<vmem>>, %arg3: memref<32x128xf32, #tpu.memory_space<vmem>>, %arg4: memref<32x128xf32, #tpu.memory_space<vmem>>, %arg5: memref<32x128xf32, #tpu.memory_space<vmem>>, %arg6: memref<1x128xf32, #tpu.memory_space<vmem>>, %arg7: memref<128x128xf32, #tpu.memory_space<vmem>>, %arg8: memref<1x128xf32, #tpu.memory_space<vmem>>, %arg9: memref<8x128xf32, #tpu.memory_space<vmem>>) attributes {dimension_semantics = [#tpu.dimension_semantics<parallel>], iteration_bounds = array<i64: 1>, scalar_prefetch = 0 : i64, scratch_operands = 0 : i64, tpu.core_type = #tpu.core_type<tc>, window_params = [{transform_indices = @transform_0, window_bounds = array<i64: 1, 64, 33>}, {pipeline_mode = #tpu.pipeline_mode<synchronous>, transform_indices = @transform_1, window_bounds = array<i64: 33, 128>}, {pipeline_mode = #tpu.pipeline_mode<synchronous>, transform_indices = @transform_2, window_bounds = array<i64: 32, 128>}, {pipeline_mode = #tpu.pipeline_mode<synchronous>, transform_indices = @transform_3, window_bounds = array<i64: 32, 128>}, {pipeline_mode = #tpu.pipeline_mode<synchronous>, transform_indices = @transform_4, window_bounds = array<i64: 32, 128>}, {pipeline_mode = #tpu.pipeline_mode<synchronous>, transform_indices = @transform_5, window_bounds = array<i64: 1, 128>}, {pipeline_mode = #tpu.pipeline_mode<synchronous>, transform_indices = @transform_6, window_bounds = array<i64: 128, 128>}, {pipeline_mode = #tpu.pipeline_mode<synchronous>, transform_indices = @transform_7, window_bounds = array<i64: 1, 128>}, {transform_indices = @transform_8, window_bounds = array<i64: 8, 128>}]} {
    %c0 = arith.constant 0 : index
    %c0_0 = arith.constant 0 : index
    %c0_1 = arith.constant 0 : index
    %0 = vector.load %arg1[%c0, %c0_0, %c0_1] : memref<1x64x33xf32, #tpu.memory_space<vmem>>, vector<1x64x33xf32>
    %1 = vector.shape_cast %0 : vector<1x64x33xf32> to vector<64x33xf32>
    %c0_2 = arith.constant 0 : index
    %c0_3 = arith.constant 0 : index
    %2 = vector.load %arg2[%c0_2, %c0_3] : memref<33x128xf32, #tpu.memory_space<vmem>>, vector<33x128xf32>
    %cst = arith.constant dense<0.000000e+00> : vector<64x128xf32>
    %3 = tpu.matmul %1, %2, %cst {dimension_numbers = #tpu.dot_dimension_numbers<[1], [0], [0], [1], [0, 0, 1, 1], [], []>} : vector<64x33xf32>, vector<33x128xf32>, vector<64x128xf32> -> vector<64x128xf32>
    %c0_4 = arith.constant 0 : index
    %c0_5 = arith.constant 0 : index
    %4 = vector.load %arg3[%c0_4, %c0_5] : memref<32x128xf32, #tpu.memory_space<vmem>>, vector<32x128xf32>
    %c0_6 = arith.constant 0 : index
    %c0_7 = arith.constant 0 : index
    %5 = vector.load %arg4[%c0_6, %c0_7] : memref<32x128xf32, #tpu.memory_space<vmem>>, vector<32x128xf32>
    %c0_8 = arith.constant 0 : index
    %c0_9 = arith.constant 0 : index
    %6 = vector.load %arg5[%c0_8, %c0_9] : memref<32x128xf32, #tpu.memory_space<vmem>>, vector<32x128xf32>
    %c0_10 = arith.constant 0 : index
    %c0_11 = arith.constant 0 : index
    %7 = vector.load %arg6[%c0_10, %c0_11] : memref<1x128xf32, #tpu.memory_space<vmem>>, vector<1x128xf32>
    %8 = vector.shape_cast %7 : vector<1x128xf32> to vector<1x128xf32>
    %9 = vector.broadcast %8 : vector<1x128xf32> to vector<8x128xf32>
    %cst_12 = arith.constant 0.000000e+00 : f32
    %10 = vector.broadcast %cst_12 : f32 to vector<8x32xf32>
    %cst_13 = arith.constant dense<0.000000e+00> : vector<8x128xf32>
    %11 = tpu.matmul %10, %6, %cst_13 {dimension_numbers = #tpu.dot_dimension_numbers<[1], [0], [0], [1], [0, 0, 1, 1], [], []>} : vector<8x32xf32>, vector<32x128xf32>, vector<8x128xf32> -> vector<8x128xf32>
    %12 = arith.addf %11, %9 : vector<8x128xf32>
    %13 = vector.extract_strided_slice %3 {offsets = [0, 0], sizes = [8, 128], strides = [1, 1]} : vector<64x128xf32> to vector<8x128xf32>
    %cst_14 = arith.constant dense<0.000000e+00> : vector<8x128xf32>
    %14 = tpu.matmul %10, %4, %cst_14 {dimension_numbers = #tpu.dot_dimension_numbers<[1], [0], [0], [1], [0, 0, 1, 1], [], []>} : vector<8x32xf32>, vector<32x128xf32>, vector<8x128xf32> -> vector<8x128xf32>
    %15 = arith.addf %13, %14 : vector<8x128xf32>
    %16 = arith.negf %15 : vector<8x128xf32>
    %17 = math.exp %16 : vector<8x128xf32>
    %cst_15 = arith.constant 1.000000e+00 : f32
    %18 = vector.broadcast %cst_15 : f32 to vector<8x128xf32>
    %19 = arith.addf %18, %17 : vector<8x128xf32>
    %20 = arith.divf %18, %19 : vector<8x128xf32>
    %21 = math.tanh %15 : vector<8x128xf32>
    %22 = vector.extract_strided_slice %20 {offsets = [0, 0], sizes = [8, 32], strides = [1, 1]} : vector<8x128xf32> to vector<8x32xf32>
    %23 = vector.extract_strided_slice %20 {offsets = [0, 32], sizes = [8, 32], strides = [1, 1]} : vector<8x128xf32> to vector<8x32xf32>
    %24 = vector.extract_strided_slice %21 {offsets = [0, 64], sizes = [8, 32], strides = [1, 1]} : vector<8x128xf32> to vector<8x32xf32>
    %25 = vector.extract_strided_slice %20 {offsets = [0, 96], sizes = [8, 32], strides = [1, 1]} : vector<8x128xf32> to vector<8x32xf32>
    %26 = arith.mulf %23, %10 : vector<8x32xf32>
    %27 = arith.mulf %22, %24 : vector<8x32xf32>
    %28 = arith.addf %26, %27 : vector<8x32xf32>
    %29 = math.tanh %28 : vector<8x32xf32>
    %30 = arith.mulf %25, %29 : vector<8x32xf32>
    %cst_16 = arith.constant dense<0.000000e+00> : vector<8x128xf32>
    %31 = tpu.matmul %30, %5, %cst_16 {dimension_numbers = #tpu.dot_dimension_numbers<[1], [0], [0], [1], [0, 0, 1, 1], [], []>} : vector<8x32xf32>, vector<32x128xf32>, vector<8x128xf32> -> vector<8x128xf32>
    %32 = arith.addf %12, %31 : vector<8x128xf32>
    %33 = arith.negf %32 : vector<8x128xf32>
    %34 = math.exp %33 : vector<8x128xf32>
    %cst_17 = arith.constant 1.000000e+00 : f32
    %35 = vector.broadcast %cst_17 : f32 to vector<8x128xf32>
    %36 = arith.addf %35, %34 : vector<8x128xf32>
    %37 = arith.divf %35, %36 : vector<8x128xf32>
    %38 = math.tanh %32 : vector<8x128xf32>
    %39 = vector.extract_strided_slice %37 {offsets = [0, 0], sizes = [8, 32], strides = [1, 1]} : vector<8x128xf32> to vector<8x32xf32>
    %40 = vector.extract_strided_slice %37 {offsets = [0, 32], sizes = [8, 32], strides = [1, 1]} : vector<8x128xf32> to vector<8x32xf32>
    %41 = vector.extract_strided_slice %38 {offsets = [0, 64], sizes = [8, 32], strides = [1, 1]} : vector<8x128xf32> to vector<8x32xf32>
    %42 = vector.extract_strided_slice %37 {offsets = [0, 96], sizes = [8, 32], strides = [1, 1]} : vector<8x128xf32> to vector<8x32xf32>
    %43 = arith.mulf %40, %10 : vector<8x32xf32>
    %44 = arith.mulf %39, %41 : vector<8x32xf32>
    %45 = arith.addf %43, %44 : vector<8x32xf32>
    %46 = math.tanh %45 : vector<8x32xf32>
    %47 = arith.mulf %42, %46 : vector<8x32xf32>
    %cst_18 = arith.constant dense<0.000000e+00> : vector<8x128xf32>
    %48 = tpu.matmul %47, %6, %cst_18 {dimension_numbers = #tpu.dot_dimension_numbers<[1], [0], [0], [1], [0, 0, 1, 1], [], []>} : vector<8x32xf32>, vector<32x128xf32>, vector<8x128xf32> -> vector<8x128xf32>
    %49 = arith.addf %48, %9 : vector<8x128xf32>
    %50 = vector.extract_strided_slice %3 {offsets = [8, 0], sizes = [8, 128], strides = [1, 1]} : vector<64x128xf32> to vector<8x128xf32>
    %cst_19 = arith.constant dense<0.000000e+00> : vector<8x128xf32>
    %51 = tpu.matmul %30, %4, %cst_19 {dimension_numbers = #tpu.dot_dimension_numbers<[1], [0], [0], [1], [0, 0, 1, 1], [], []>} : vector<8x32xf32>, vector<32x128xf32>, vector<8x128xf32> -> vector<8x128xf32>
    %52 = arith.addf %50, %51 : vector<8x128xf32>
    %53 = arith.negf %52 : vector<8x128xf32>
    %54 = math.exp %53 : vector<8x128xf32>
    %cst_20 = arith.constant 1.000000e+00 : f32
    %55 = vector.broadcast %cst_20 : f32 to vector<8x128xf32>
    %56 = arith.addf %55, %54 : vector<8x128xf32>
    %57 = arith.divf %55, %56 : vector<8x128xf32>
    %58 = math.tanh %52 : vector<8x128xf32>
    %59 = vector.extract_strided_slice %57 {offsets = [0, 0], sizes = [8, 32], strides = [1, 1]} : vector<8x128xf32> to vector<8x32xf32>
    %60 = vector.extract_strided_slice %57 {offsets = [0, 32], sizes = [8, 32], strides = [1, 1]} : vector<8x128xf32> to vector<8x32xf32>
    %61 = vector.extract_strided_slice %58 {offsets = [0, 64], sizes = [8, 32], strides = [1, 1]} : vector<8x128xf32> to vector<8x32xf32>
    %62 = vector.extract_strided_slice %57 {offsets = [0, 96], sizes = [8, 32], strides = [1, 1]} : vector<8x128xf32> to vector<8x32xf32>
    %63 = arith.mulf %60, %28 : vector<8x32xf32>
    %64 = arith.mulf %59, %61 : vector<8x32xf32>
    %65 = arith.addf %63, %64 : vector<8x32xf32>
    %66 = math.tanh %65 : vector<8x32xf32>
    %67 = arith.mulf %62, %66 : vector<8x32xf32>
    %cst_21 = arith.constant dense<0.000000e+00> : vector<8x128xf32>
    %68 = tpu.matmul %67, %5, %cst_21 {dimension_numbers = #tpu.dot_dimension_numbers<[1], [0], [0], [1], [0, 0, 1, 1], [], []>} : vector<8x32xf32>, vector<32x128xf32>, vector<8x128xf32> -> vector<8x128xf32>
    %69 = arith.addf %49, %68 : vector<8x128xf32>
    %70 = arith.negf %69 : vector<8x128xf32>
    %71 = math.exp %70 : vector<8x128xf32>
    %cst_22 = arith.constant 1.000000e+00 : f32
    %72 = vector.broadcast %cst_22 : f32 to vector<8x128xf32>
    %73 = arith.addf %72, %71 : vector<8x128xf32>
    %74 = arith.divf %72, %73 : vector<8x128xf32>
    %75 = math.tanh %69 : vector<8x128xf32>
    %76 = vector.extract_strided_slice %74 {offsets = [0, 0], sizes = [8, 32], strides = [1, 1]} : vector<8x128xf32> to vector<8x32xf32>
    %77 = vector.extract_strided_slice %74 {offsets = [0, 32], sizes = [8, 32], strides = [1, 1]} : vector<8x128xf32> to vector<8x32xf32>
    %78 = vector.extract_strided_slice %75 {offsets = [0, 64], sizes = [8, 32], strides = [1, 1]} : vector<8x128xf32> to vector<8x32xf32>
    %79 = vector.extract_strided_slice %74 {offsets = [0, 96], sizes = [8, 32], strides = [1, 1]} : vector<8x128xf32> to vector<8x32xf32>
    %80 = arith.mulf %77, %45 : vector<8x32xf32>
    %81 = arith.mulf %76, %78 : vector<8x32xf32>
    %82 = arith.addf %80, %81 : vector<8x32xf32>
    %83 = math.tanh %82 : vector<8x32xf32>
    %84 = arith.mulf %79, %83 : vector<8x32xf32>
    %cst_23 = arith.constant dense<0.000000e+00> : vector<8x128xf32>
    %85 = tpu.matmul %84, %6, %cst_23 {dimension_numbers = #tpu.dot_dimension_numbers<[1], [0], [0], [1], [0, 0, 1, 1], [], []>} : vector<8x32xf32>, vector<32x128xf32>, vector<8x128xf32> -> vector<8x128xf32>
    %86 = arith.addf %85, %9 : vector<8x128xf32>
    %87 = vector.extract_strided_slice %3 {offsets = [16, 0], sizes = [8, 128], strides = [1, 1]} : vector<64x128xf32> to vector<8x128xf32>
    %cst_24 = arith.constant dense<0.000000e+00> : vector<8x128xf32>
    %88 = tpu.matmul %67, %4, %cst_24 {dimension_numbers = #tpu.dot_dimension_numbers<[1], [0], [0], [1], [0, 0, 1, 1], [], []>} : vector<8x32xf32>, vector<32x128xf32>, vector<8x128xf32> -> vector<8x128xf32>
    %89 = arith.addf %87, %88 : vector<8x128xf32>
    %90 = arith.negf %89 : vector<8x128xf32>
    %91 = math.exp %90 : vector<8x128xf32>
    %cst_25 = arith.constant 1.000000e+00 : f32
    %92 = vector.broadcast %cst_25 : f32 to vector<8x128xf32>
    %93 = arith.addf %92, %91 : vector<8x128xf32>
    %94 = arith.divf %92, %93 : vector<8x128xf32>
    %95 = math.tanh %89 : vector<8x128xf32>
    %96 = vector.extract_strided_slice %94 {offsets = [0, 0], sizes = [8, 32], strides = [1, 1]} : vector<8x128xf32> to vector<8x32xf32>
    %97 = vector.extract_strided_slice %94 {offsets = [0, 32], sizes = [8, 32], strides = [1, 1]} : vector<8x128xf32> to vector<8x32xf32>
    %98 = vector.extract_strided_slice %95 {offsets = [0, 64], sizes = [8, 32], strides = [1, 1]} : vector<8x128xf32> to vector<8x32xf32>
    %99 = vector.extract_strided_slice %94 {offsets = [0, 96], sizes = [8, 32], strides = [1, 1]} : vector<8x128xf32> to vector<8x32xf32>
    %100 = arith.mulf %97, %65 : vector<8x32xf32>
    %101 = arith.mulf %96, %98 : vector<8x32xf32>
    %102 = arith.addf %100, %101 : vector<8x32xf32>
    %103 = math.tanh %102 : vector<8x32xf32>
    %104 = arith.mulf %99, %103 : vector<8x32xf32>
    %cst_26 = arith.constant dense<0.000000e+00> : vector<8x128xf32>
    %105 = tpu.matmul %104, %5, %cst_26 {dimension_numbers = #tpu.dot_dimension_numbers<[1], [0], [0], [1], [0, 0, 1, 1], [], []>} : vector<8x32xf32>, vector<32x128xf32>, vector<8x128xf32> -> vector<8x128xf32>
    %106 = arith.addf %86, %105 : vector<8x128xf32>
    %107 = arith.negf %106 : vector<8x128xf32>
    %108 = math.exp %107 : vector<8x128xf32>
    %cst_27 = arith.constant 1.000000e+00 : f32
    %109 = vector.broadcast %cst_27 : f32 to vector<8x128xf32>
    %110 = arith.addf %109, %108 : vector<8x128xf32>
    %111 = arith.divf %109, %110 : vector<8x128xf32>
    %112 = math.tanh %106 : vector<8x128xf32>
    %113 = vector.extract_strided_slice %111 {offsets = [0, 0], sizes = [8, 32], strides = [1, 1]} : vector<8x128xf32> to vector<8x32xf32>
    %114 = vector.extract_strided_slice %111 {offsets = [0, 32], sizes = [8, 32], strides = [1, 1]} : vector<8x128xf32> to vector<8x32xf32>
    %115 = vector.extract_strided_slice %112 {offsets = [0, 64], sizes = [8, 32], strides = [1, 1]} : vector<8x128xf32> to vector<8x32xf32>
    %116 = vector.extract_strided_slice %111 {offsets = [0, 96], sizes = [8, 32], strides = [1, 1]} : vector<8x128xf32> to vector<8x32xf32>
    %117 = arith.mulf %114, %82 : vector<8x32xf32>
    %118 = arith.mulf %113, %115 : vector<8x32xf32>
    %119 = arith.addf %117, %118 : vector<8x32xf32>
    %120 = math.tanh %119 : vector<8x32xf32>
    %121 = arith.mulf %116, %120 : vector<8x32xf32>
    %cst_28 = arith.constant dense<0.000000e+00> : vector<8x128xf32>
    %122 = tpu.matmul %121, %6, %cst_28 {dimension_numbers = #tpu.dot_dimension_numbers<[1], [0], [0], [1], [0, 0, 1, 1], [], []>} : vector<8x32xf32>, vector<32x128xf32>, vector<8x128xf32> -> vector<8x128xf32>
    %123 = arith.addf %122, %9 : vector<8x128xf32>
    %124 = vector.extract_strided_slice %3 {offsets = [24, 0], sizes = [8, 128], strides = [1, 1]} : vector<64x128xf32> to vector<8x128xf32>
    %cst_29 = arith.constant dense<0.000000e+00> : vector<8x128xf32>
    %125 = tpu.matmul %104, %4, %cst_29 {dimension_numbers = #tpu.dot_dimension_numbers<[1], [0], [0], [1], [0, 0, 1, 1], [], []>} : vector<8x32xf32>, vector<32x128xf32>, vector<8x128xf32> -> vector<8x128xf32>
    %126 = arith.addf %124, %125 : vector<8x128xf32>
    %127 = arith.negf %126 : vector<8x128xf32>
    %128 = math.exp %127 : vector<8x128xf32>
    %cst_30 = arith.constant 1.000000e+00 : f32
    %129 = vector.broadcast %cst_30 : f32 to vector<8x128xf32>
    %130 = arith.addf %129, %128 : vector<8x128xf32>
    %131 = arith.divf %129, %130 : vector<8x128xf32>
    %132 = math.tanh %126 : vector<8x128xf32>
    %133 = vector.extract_strided_slice %131 {offsets = [0, 0], sizes = [8, 32], strides = [1, 1]} : vector<8x128xf32> to vector<8x32xf32>
    %134 = vector.extract_strided_slice %131 {offsets = [0, 32], sizes = [8, 32], strides = [1, 1]} : vector<8x128xf32> to vector<8x32xf32>
    %135 = vector.extract_strided_slice %132 {offsets = [0, 64], sizes = [8, 32], strides = [1, 1]} : vector<8x128xf32> to vector<8x32xf32>
    %136 = vector.extract_strided_slice %131 {offsets = [0, 96], sizes = [8, 32], strides = [1, 1]} : vector<8x128xf32> to vector<8x32xf32>
    %137 = arith.mulf %134, %102 : vector<8x32xf32>
    %138 = arith.mulf %133, %135 : vector<8x32xf32>
    %139 = arith.addf %137, %138 : vector<8x32xf32>
    %140 = math.tanh %139 : vector<8x32xf32>
    %141 = arith.mulf %136, %140 : vector<8x32xf32>
    %cst_31 = arith.constant dense<0.000000e+00> : vector<8x128xf32>
    %142 = tpu.matmul %141, %5, %cst_31 {dimension_numbers = #tpu.dot_dimension_numbers<[1], [0], [0], [1], [0, 0, 1, 1], [], []>} : vector<8x32xf32>, vector<32x128xf32>, vector<8x128xf32> -> vector<8x128xf32>
    %143 = arith.addf %123, %142 : vector<8x128xf32>
    %144 = arith.negf %143 : vector<8x128xf32>
    %145 = math.exp %144 : vector<8x128xf32>
    %cst_32 = arith.constant 1.000000e+00 : f32
    %146 = vector.broadcast %cst_32 : f32 to vector<8x128xf32>
    %147 = arith.addf %146, %145 : vector<8x128xf32>
    %148 = arith.divf %146, %147 : vector<8x128xf32>
    %149 = math.tanh %143 : vector<8x128xf32>
    %150 = vector.extract_strided_slice %148 {offsets = [0, 0], sizes = [8, 32], strides = [1, 1]} : vector<8x128xf32> to vector<8x32xf32>
    %151 = vector.extract_strided_slice %148 {offsets = [0, 32], sizes = [8, 32], strides = [1, 1]} : vector<8x128xf32> to vector<8x32xf32>
    %152 = vector.extract_strided_slice %149 {offsets = [0, 64], sizes = [8, 32], strides = [1, 1]} : vector<8x128xf32> to vector<8x32xf32>
    %153 = vector.extract_strided_slice %148 {offsets = [0, 96], sizes = [8, 32], strides = [1, 1]} : vector<8x128xf32> to vector<8x32xf32>
    %154 = arith.mulf %151, %119 : vector<8x32xf32>
    %155 = arith.mulf %150, %152 : vector<8x32xf32>
    %156 = arith.addf %154, %155 : vector<8x32xf32>
    %157 = math.tanh %156 : vector<8x32xf32>
    %158 = arith.mulf %153, %157 : vector<8x32xf32>
    %cst_33 = arith.constant dense<0.000000e+00> : vector<8x128xf32>
    %159 = tpu.matmul %158, %6, %cst_33 {dimension_numbers = #tpu.dot_dimension_numbers<[1], [0], [0], [1], [0, 0, 1, 1], [], []>} : vector<8x32xf32>, vector<32x128xf32>, vector<8x128xf32> -> vector<8x128xf32>
    %160 = arith.addf %159, %9 : vector<8x128xf32>
    %161 = vector.extract_strided_slice %3 {offsets = [32, 0], sizes = [8, 128], strides = [1, 1]} : vector<64x128xf32> to vector<8x128xf32>
    %cst_34 = arith.constant dense<0.000000e+00> : vector<8x128xf32>
    %162 = tpu.matmul %141, %4, %cst_34 {dimension_numbers = #tpu.dot_dimension_numbers<[1], [0], [0], [1], [0, 0, 1, 1], [], []>} : vector<8x32xf32>, vector<32x128xf32>, vector<8x128xf32> -> vector<8x128xf32>
    %163 = arith.addf %161, %162 : vector<8x128xf32>
    %164 = arith.negf %163 : vector<8x128xf32>
    %165 = math.exp %164 : vector<8x128xf32>
    %cst_35 = arith.constant 1.000000e+00 : f32
    %166 = vector.broadcast %cst_35 : f32 to vector<8x128xf32>
    %167 = arith.addf %166, %165 : vector<8x128xf32>
    %168 = arith.divf %166, %167 : vector<8x128xf32>
    %169 = math.tanh %163 : vector<8x128xf32>
    %170 = vector.extract_strided_slice %168 {offsets = [0, 0], sizes = [8, 32], strides = [1, 1]} : vector<8x128xf32> to vector<8x32xf32>
    %171 = vector.extract_strided_slice %168 {offsets = [0, 32], sizes = [8, 32], strides = [1, 1]} : vector<8x128xf32> to vector<8x32xf32>
    %172 = vector.extract_strided_slice %169 {offsets = [0, 64], sizes = [8, 32], strides = [1, 1]} : vector<8x128xf32> to vector<8x32xf32>
    %173 = vector.extract_strided_slice %168 {offsets = [0, 96], sizes = [8, 32], strides = [1, 1]} : vector<8x128xf32> to vector<8x32xf32>
    %174 = arith.mulf %171, %139 : vector<8x32xf32>
    %175 = arith.mulf %170, %172 : vector<8x32xf32>
    %176 = arith.addf %174, %175 : vector<8x32xf32>
    %177 = math.tanh %176 : vector<8x32xf32>
    %178 = arith.mulf %173, %177 : vector<8x32xf32>
    %cst_36 = arith.constant dense<0.000000e+00> : vector<8x128xf32>
    %179 = tpu.matmul %178, %5, %cst_36 {dimension_numbers = #tpu.dot_dimension_numbers<[1], [0], [0], [1], [0, 0, 1, 1], [], []>} : vector<8x32xf32>, vector<32x128xf32>, vector<8x128xf32> -> vector<8x128xf32>
    %180 = arith.addf %160, %179 : vector<8x128xf32>
    %181 = arith.negf %180 : vector<8x128xf32>
    %182 = math.exp %181 : vector<8x128xf32>
    %cst_37 = arith.constant 1.000000e+00 : f32
    %183 = vector.broadcast %cst_37 : f32 to vector<8x128xf32>
    %184 = arith.addf %183, %182 : vector<8x128xf32>
    %185 = arith.divf %183, %184 : vector<8x128xf32>
    %186 = math.tanh %180 : vector<8x128xf32>
    %187 = vector.extract_strided_slice %185 {offsets = [0, 0], sizes = [8, 32], strides = [1, 1]} : vector<8x128xf32> to vector<8x32xf32>
    %188 = vector.extract_strided_slice %185 {offsets = [0, 32], sizes = [8, 32], strides = [1, 1]} : vector<8x128xf32> to vector<8x32xf32>
    %189 = vector.extract_strided_slice %186 {offsets = [0, 64], sizes = [8, 32], strides = [1, 1]} : vector<8x128xf32> to vector<8x32xf32>
    %190 = vector.extract_strided_slice %185 {offsets = [0, 96], sizes = [8, 32], strides = [1, 1]} : vector<8x128xf32> to vector<8x32xf32>
    %191 = arith.mulf %188, %156 : vector<8x32xf32>
    %192 = arith.mulf %187, %189 : vector<8x32xf32>
    %193 = arith.addf %191, %192 : vector<8x32xf32>
    %194 = math.tanh %193 : vector<8x32xf32>
    %195 = arith.mulf %190, %194 : vector<8x32xf32>
    %cst_38 = arith.constant dense<0.000000e+00> : vector<8x128xf32>
    %196 = tpu.matmul %195, %6, %cst_38 {dimension_numbers = #tpu.dot_dimension_numbers<[1], [0], [0], [1], [0, 0, 1, 1], [], []>} : vector<8x32xf32>, vector<32x128xf32>, vector<8x128xf32> -> vector<8x128xf32>
    %197 = arith.addf %196, %9 : vector<8x128xf32>
    %198 = vector.extract_strided_slice %3 {offsets = [40, 0], sizes = [8, 128], strides = [1, 1]} : vector<64x128xf32> to vector<8x128xf32>
    %cst_39 = arith.constant dense<0.000000e+00> : vector<8x128xf32>
    %199 = tpu.matmul %178, %4, %cst_39 {dimension_numbers = #tpu.dot_dimension_numbers<[1], [0], [0], [1], [0, 0, 1, 1], [], []>} : vector<8x32xf32>, vector<32x128xf32>, vector<8x128xf32> -> vector<8x128xf32>
    %200 = arith.addf %198, %199 : vector<8x128xf32>
    %201 = arith.negf %200 : vector<8x128xf32>
    %202 = math.exp %201 : vector<8x128xf32>
    %cst_40 = arith.constant 1.000000e+00 : f32
    %203 = vector.broadcast %cst_40 : f32 to vector<8x128xf32>
    %204 = arith.addf %203, %202 : vector<8x128xf32>
    %205 = arith.divf %203, %204 : vector<8x128xf32>
    %206 = math.tanh %200 : vector<8x128xf32>
    %207 = vector.extract_strided_slice %205 {offsets = [0, 0], sizes = [8, 32], strides = [1, 1]} : vector<8x128xf32> to vector<8x32xf32>
    %208 = vector.extract_strided_slice %205 {offsets = [0, 32], sizes = [8, 32], strides = [1, 1]} : vector<8x128xf32> to vector<8x32xf32>
    %209 = vector.extract_strided_slice %206 {offsets = [0, 64], sizes = [8, 32], strides = [1, 1]} : vector<8x128xf32> to vector<8x32xf32>
    %210 = vector.extract_strided_slice %205 {offsets = [0, 96], sizes = [8, 32], strides = [1, 1]} : vector<8x128xf32> to vector<8x32xf32>
    %211 = arith.mulf %208, %176 : vector<8x32xf32>
    %212 = arith.mulf %207, %209 : vector<8x32xf32>
    %213 = arith.addf %211, %212 : vector<8x32xf32>
    %214 = math.tanh %213 : vector<8x32xf32>
    %215 = arith.mulf %210, %214 : vector<8x32xf32>
    %cst_41 = arith.constant dense<0.000000e+00> : vector<8x128xf32>
    %216 = tpu.matmul %215, %5, %cst_41 {dimension_numbers = #tpu.dot_dimension_numbers<[1], [0], [0], [1], [0, 0, 1, 1], [], []>} : vector<8x32xf32>, vector<32x128xf32>, vector<8x128xf32> -> vector<8x128xf32>
    %217 = arith.addf %197, %216 : vector<8x128xf32>
    %218 = arith.negf %217 : vector<8x128xf32>
    %219 = math.exp %218 : vector<8x128xf32>
    %cst_42 = arith.constant 1.000000e+00 : f32
    %220 = vector.broadcast %cst_42 : f32 to vector<8x128xf32>
    %221 = arith.addf %220, %219 : vector<8x128xf32>
    %222 = arith.divf %220, %221 : vector<8x128xf32>
    %223 = math.tanh %217 : vector<8x128xf32>
    %224 = vector.extract_strided_slice %222 {offsets = [0, 0], sizes = [8, 32], strides = [1, 1]} : vector<8x128xf32> to vector<8x32xf32>
    %225 = vector.extract_strided_slice %222 {offsets = [0, 32], sizes = [8, 32], strides = [1, 1]} : vector<8x128xf32> to vector<8x32xf32>
    %226 = vector.extract_strided_slice %223 {offsets = [0, 64], sizes = [8, 32], strides = [1, 1]} : vector<8x128xf32> to vector<8x32xf32>
    %227 = vector.extract_strided_slice %222 {offsets = [0, 96], sizes = [8, 32], strides = [1, 1]} : vector<8x128xf32> to vector<8x32xf32>
    %228 = arith.mulf %225, %193 : vector<8x32xf32>
    %229 = arith.mulf %224, %226 : vector<8x32xf32>
    %230 = arith.addf %228, %229 : vector<8x32xf32>
    %231 = math.tanh %230 : vector<8x32xf32>
    %232 = arith.mulf %227, %231 : vector<8x32xf32>
    %cst_43 = arith.constant dense<0.000000e+00> : vector<8x128xf32>
    %233 = tpu.matmul %232, %6, %cst_43 {dimension_numbers = #tpu.dot_dimension_numbers<[1], [0], [0], [1], [0, 0, 1, 1], [], []>} : vector<8x32xf32>, vector<32x128xf32>, vector<8x128xf32> -> vector<8x128xf32>
    %234 = arith.addf %233, %9 : vector<8x128xf32>
    %235 = vector.extract_strided_slice %3 {offsets = [48, 0], sizes = [8, 128], strides = [1, 1]} : vector<64x128xf32> to vector<8x128xf32>
    %cst_44 = arith.constant dense<0.000000e+00> : vector<8x128xf32>
    %236 = tpu.matmul %215, %4, %cst_44 {dimension_numbers = #tpu.dot_dimension_numbers<[1], [0], [0], [1], [0, 0, 1, 1], [], []>} : vector<8x32xf32>, vector<32x128xf32>, vector<8x128xf32> -> vector<8x128xf32>
    %237 = arith.addf %235, %236 : vector<8x128xf32>
    %238 = arith.negf %237 : vector<8x128xf32>
    %239 = math.exp %238 : vector<8x128xf32>
    %cst_45 = arith.constant 1.000000e+00 : f32
    %240 = vector.broadcast %cst_45 : f32 to vector<8x128xf32>
    %241 = arith.addf %240, %239 : vector<8x128xf32>
    %242 = arith.divf %240, %241 : vector<8x128xf32>
    %243 = math.tanh %237 : vector<8x128xf32>
    %244 = vector.extract_strided_slice %242 {offsets = [0, 0], sizes = [8, 32], strides = [1, 1]} : vector<8x128xf32> to vector<8x32xf32>
    %245 = vector.extract_strided_slice %242 {offsets = [0, 32], sizes = [8, 32], strides = [1, 1]} : vector<8x128xf32> to vector<8x32xf32>
    %246 = vector.extract_strided_slice %243 {offsets = [0, 64], sizes = [8, 32], strides = [1, 1]} : vector<8x128xf32> to vector<8x32xf32>
    %247 = vector.extract_strided_slice %242 {offsets = [0, 96], sizes = [8, 32], strides = [1, 1]} : vector<8x128xf32> to vector<8x32xf32>
    %248 = arith.mulf %245, %213 : vector<8x32xf32>
    %249 = arith.mulf %244, %246 : vector<8x32xf32>
    %250 = arith.addf %248, %249 : vector<8x32xf32>
    %251 = math.tanh %250 : vector<8x32xf32>
    %252 = arith.mulf %247, %251 : vector<8x32xf32>
    %cst_46 = arith.constant dense<0.000000e+00> : vector<8x128xf32>
    %253 = tpu.matmul %252, %5, %cst_46 {dimension_numbers = #tpu.dot_dimension_numbers<[1], [0], [0], [1], [0, 0, 1, 1], [], []>} : vector<8x32xf32>, vector<32x128xf32>, vector<8x128xf32> -> vector<8x128xf32>
    %254 = arith.addf %234, %253 : vector<8x128xf32>
    %255 = arith.negf %254 : vector<8x128xf32>
    %256 = math.exp %255 : vector<8x128xf32>
    %cst_47 = arith.constant 1.000000e+00 : f32
    %257 = vector.broadcast %cst_47 : f32 to vector<8x128xf32>
    %258 = arith.addf %257, %256 : vector<8x128xf32>
    %259 = arith.divf %257, %258 : vector<8x128xf32>
    %260 = math.tanh %254 : vector<8x128xf32>
    %261 = vector.extract_strided_slice %259 {offsets = [0, 0], sizes = [8, 32], strides = [1, 1]} : vector<8x128xf32> to vector<8x32xf32>
    %262 = vector.extract_strided_slice %259 {offsets = [0, 32], sizes = [8, 32], strides = [1, 1]} : vector<8x128xf32> to vector<8x32xf32>
    %263 = vector.extract_strided_slice %260 {offsets = [0, 64], sizes = [8, 32], strides = [1, 1]} : vector<8x128xf32> to vector<8x32xf32>
    %264 = vector.extract_strided_slice %259 {offsets = [0, 96], sizes = [8, 32], strides = [1, 1]} : vector<8x128xf32> to vector<8x32xf32>
    %265 = arith.mulf %262, %230 : vector<8x32xf32>
    %266 = arith.mulf %261, %263 : vector<8x32xf32>
    %267 = arith.addf %265, %266 : vector<8x32xf32>
    %268 = math.tanh %267 : vector<8x32xf32>
    %269 = arith.mulf %264, %268 : vector<8x32xf32>
    %cst_48 = arith.constant dense<0.000000e+00> : vector<8x128xf32>
    %270 = tpu.matmul %269, %6, %cst_48 {dimension_numbers = #tpu.dot_dimension_numbers<[1], [0], [0], [1], [0, 0, 1, 1], [], []>} : vector<8x32xf32>, vector<32x128xf32>, vector<8x128xf32> -> vector<8x128xf32>
    %271 = arith.addf %270, %9 : vector<8x128xf32>
    %272 = vector.extract_strided_slice %3 {offsets = [56, 0], sizes = [8, 128], strides = [1, 1]} : vector<64x128xf32> to vector<8x128xf32>
    %cst_49 = arith.constant dense<0.000000e+00> : vector<8x128xf32>
    %273 = tpu.matmul %252, %4, %cst_49 {dimension_numbers = #tpu.dot_dimension_numbers<[1], [0], [0], [1], [0, 0, 1, 1], [], []>} : vector<8x32xf32>, vector<32x128xf32>, vector<8x128xf32> -> vector<8x128xf32>
    %274 = arith.addf %272, %273 : vector<8x128xf32>
    %275 = arith.negf %274 : vector<8x128xf32>
    %276 = math.exp %275 : vector<8x128xf32>
    %cst_50 = arith.constant 1.000000e+00 : f32
    %277 = vector.broadcast %cst_50 : f32 to vector<8x128xf32>
    %278 = arith.addf %277, %276 : vector<8x128xf32>
    %279 = arith.divf %277, %278 : vector<8x128xf32>
    %280 = math.tanh %274 : vector<8x128xf32>
    %281 = vector.extract_strided_slice %279 {offsets = [0, 0], sizes = [8, 32], strides = [1, 1]} : vector<8x128xf32> to vector<8x32xf32>
    %282 = vector.extract_strided_slice %279 {offsets = [0, 32], sizes = [8, 32], strides = [1, 1]} : vector<8x128xf32> to vector<8x32xf32>
    %283 = vector.extract_strided_slice %280 {offsets = [0, 64], sizes = [8, 32], strides = [1, 1]} : vector<8x128xf32> to vector<8x32xf32>
    %284 = vector.extract_strided_slice %279 {offsets = [0, 96], sizes = [8, 32], strides = [1, 1]} : vector<8x128xf32> to vector<8x32xf32>
    %285 = arith.mulf %282, %250 : vector<8x32xf32>
    %286 = arith.mulf %281, %283 : vector<8x32xf32>
    %287 = arith.addf %285, %286 : vector<8x32xf32>
    %288 = math.tanh %287 : vector<8x32xf32>
    %289 = arith.mulf %284, %288 : vector<8x32xf32>
    %cst_51 = arith.constant dense<0.000000e+00> : vector<8x128xf32>
    %290 = tpu.matmul %289, %5, %cst_51 {dimension_numbers = #tpu.dot_dimension_numbers<[1], [0], [0], [1], [0, 0, 1, 1], [], []>} : vector<8x32xf32>, vector<32x128xf32>, vector<8x128xf32> -> vector<8x128xf32>
    %291 = arith.addf %271, %290 : vector<8x128xf32>
    %292 = arith.negf %291 : vector<8x128xf32>
    %293 = math.exp %292 : vector<8x128xf32>
    %cst_52 = arith.constant 1.000000e+00 : f32
    %294 = vector.broadcast %cst_52 : f32 to vector<8x128xf32>
    %295 = arith.addf %294, %293 : vector<8x128xf32>
    %296 = arith.divf %294, %295 : vector<8x128xf32>
    %297 = math.tanh %291 : vector<8x128xf32>
    %298 = vector.extract_strided_slice %296 {offsets = [0, 0], sizes = [8, 32], strides = [1, 1]} : vector<8x128xf32> to vector<8x32xf32>
    %299 = vector.extract_strided_slice %296 {offsets = [0, 32], sizes = [8, 32], strides = [1, 1]} : vector<8x128xf32> to vector<8x32xf32>
    %300 = vector.extract_strided_slice %297 {offsets = [0, 64], sizes = [8, 32], strides = [1, 1]} : vector<8x128xf32> to vector<8x32xf32>
    %301 = vector.extract_strided_slice %296 {offsets = [0, 96], sizes = [8, 32], strides = [1, 1]} : vector<8x128xf32> to vector<8x32xf32>
    %302 = arith.mulf %299, %267 : vector<8x32xf32>
    %303 = arith.mulf %298, %300 : vector<8x32xf32>
    %304 = arith.addf %302, %303 : vector<8x32xf32>
    %305 = math.tanh %304 : vector<8x32xf32>
    %306 = arith.mulf %301, %305 : vector<8x32xf32>
    %307 = tpu.concatenate %289, %287, %306, %304 in 1 : vector<8x32xf32>, vector<8x32xf32>, vector<8x32xf32>, vector<8x32xf32> -> vector<8x128xf32>
    %c0_53 = arith.constant 0 : index
    %c0_54 = arith.constant 0 : index
    %308 = vector.load %arg7[%c0_53, %c0_54] : memref<128x128xf32, #tpu.memory_space<vmem>>, vector<128x128xf32>
    %cst_55 = arith.constant dense<0.000000e+00> : vector<8x128xf32>
    %309 = tpu.matmul %307, %308, %cst_55 {dimension_numbers = #tpu.dot_dimension_numbers<[1], [0], [0], [1], [0, 0, 1, 1], [], []>} : vector<8x128xf32>, vector<128x128xf32>, vector<8x128xf32> -> vector<8x128xf32>
    %c0_56 = arith.constant 0 : index
    %c0_57 = arith.constant 0 : index
    %310 = vector.load %arg8[%c0_56, %c0_57] : memref<1x128xf32, #tpu.memory_space<vmem>>, vector<1x128xf32>
    %311 = vector.broadcast %310 : vector<1x128xf32> to vector<8x128xf32>
    %312 = arith.addf %309, %311 : vector<8x128xf32>
    %313 = math.tanh %312 : vector<8x128xf32>
    %c0_58 = arith.constant 0 : index
    %c0_59 = arith.constant 0 : index
    %314 = vector.load %arg9[%c0_58, %c0_59] : memref<8x128xf32, #tpu.memory_space<vmem>>, vector<8x128xf32>
    tpu.vector_store %arg9[%c0_58, %c0_59], %313 {strides = array<i32>} : memref<8x128xf32, #tpu.memory_space<vmem>>, vector<8x128xf32>,
    return
  }
  func.func @transform_0(%arg0: i32) -> (i32, i32, i32) {
    %c0_i32 = arith.constant 0 : i32
    %c0_i32_0 = arith.constant 0 : i32
    %c0_i32_1 = arith.constant 0 : i32
    return %arg0, %c0_i32, %c0_i32_0 : i32, i32, i32
  }
  func.func @transform_1(%arg0: i32) -> (i32, i32) {
    %c0_i32 = arith.constant 0 : i32
    %c0_i32_0 = arith.constant 0 : i32
    %c0_i32_1 = arith.constant 0 : i32
    return %c0_i32, %c0_i32_0 : i32, i32
  }
  func.func @transform_2(%arg0: i32) -> (i32, i32) {
    %c0_i32 = arith.constant 0 : i32
    %c0_i32_0 = arith.constant 0 : i32
    %c0_i32_1 = arith.constant 0 : i32
    return %c0_i32, %c0_i32_0 : i32, i32
  }
  func.func @transform_3(%arg0: i32) -> (i32, i32) {
    %c0_i32 = arith.constant 0 : i32
    %c0_i32_0 = arith.constant 0 : i32
    %c0_i32_1 = arith.constant 0 : i32
    return %c0_i32, %c0_i32_0 : i32, i32
  }
  func.func @transform_4(%arg0: i32) -> (i32, i32) {
    %c0_i32 = arith.constant 0 : i32
    %c0_i32_0 = arith.constant 0 : i32
    %c0_i32_1 = arith.constant 0 : i32
    return %c0_i32, %c0_i32_0 : i32, i32
  }
  func.func @transform_5(%arg0: i32) -> (i32, i32) {
    %c0_i32 = arith.constant 0 : i32
    %c0_i32_0 = arith.constant 0 : i32
    %c0_i32_1 = arith.constant 0 : i32
    return %c0_i32, %c0_i32_0 : i32, i32
  }
  func.func @transform_6(%arg0: i32) -> (i32, i32) {
    %c0_i32 = arith.constant 0 : i32
    %c0_i32_0 = arith.constant 0 : i32
    %c0_i32_1 = arith.constant 0 : i32
    return %c0_i32, %c0_i32_0 : i32, i32
  }
  func.func @transform_7(%arg0: i32) -> (i32, i32) {
    %c0_i32 = arith.constant 0 : i32
    %c0_i32_0 = arith.constant 0 : i32
    %c0_i32_1 = arith.constant 0 : i32
    return %c0_i32, %c0_i32_0 : i32, i32
  }
  func.func @transform_8(%arg0: i32) -> (i32, i32) {
    %c0_i32 = arith.constant 0 : i32
    %c0_i32_0 = arith.constant 0 : i32
    return %arg0, %c0_i32 : i32, i32
  }
}

</mosaic_0001>

<bundles_post_ra>
// kernel: tpu_custom_call.1
= control target key start
LH: loop header
LB: loop body
LE: loop exit
PB: predicated region body
PF: predicated region fallthrough
CT: control target
= control target key end

     0   :  { %13 = vsyncpa [#allocation3], 0  ;;  %s3947_s0 = inlined_call_operand.vmem [shape: f32[1,64,33], index: 0, kind: input, shape index: {}]   ;;  %s3948_s1 = inlined_call_operand.vmem [shape: f32[33,128], index: 1, kind: input, shape index: {}]   ;;  %s3949_s2 = inlined_call_operand.vmem [shape: f32[32,128], index: 2, kind: input, shape index: {}]   ;;  %s3950_s3 = inlined_call_operand.vmem [shape: f32[32,128], index: 3, kind: input, shape index: {}]   ;;  %s3951_s4 = inlined_call_operand.hbm [shape: f32[32,128], index: 4, kind: input, shape index: {}]   ;;  %s3952_s5 = inlined_call_operand.vmem [shape: f32[1,128], index: 5, kind: input, shape index: {}]   ;;  %s3953_s6 = inlined_call_operand.hbm [shape: f32[128,128], index: 6, kind: input, shape index: {}]   ;;  %s3954_s7 = inlined_call_operand.vmem [shape: f32[1,128], index: 7, kind: input, shape index: {}]   ;;  %s3955_s8 = inlined_call_operand.hbm [shape: f32[8,128], index: 8, kind: output, shape index: {}]  }
   0x1   :  { %14 = vsyncpa [#allocation6], 0 }
   0x2   :  { %15 = vsyncpa [#allocation4], 0  ;;  %s3440_s27 = smov [#allocation2]   ;;  %s3368_s9 = scalar_lea.hbm %s3951_s4, 512 }
   0x3   :  { %s29_s28 = sshll.u32 %s3440_s27, 4  ;;  %p3369_p0 = scmp.ne.s32.totalorder %s3951_s4, %s3368_s9  ;;  %s30_s28 = int_to_ptr.vmem [resolvable:$true] %s29_s28 }
   0x4   :  { %p3372_p1 = scmp.lt.u32.totalorder %s3368_s9, %s3951_s4 }
   0x6   :  { %p3374_p2 = pnand %p3372_p1, %p3369_p0 }
   0x8   :  { %3377 = shalt.err (!%p3374_p2)
}
   0x9   :  { %s3378_s14 = scalar_lea.vmem %s30_s28, 512  ;;  %p3383_p4 = scmp.lt.s32.totalorder %s30_s28, %s30_s28 }
   0xa   :  { %p3379_p3 = scmp.ne.s32.totalorder %s30_s28, %s3378_s14  ;;  %p3384_p5 = scmp.lt.s32.totalorder %s3378_s14, %s3378_s14 }
   0xc   :  { %p3385_p6 = por %p3384_p5, %p3383_p4 }
   0xe   :  { %p3386_p7 = pnand %p3385_p6, %p3379_p3 }
  0x10   :  { %3389 = shalt.err (!%p3386_p7)
}
  0x11   :  { %s3441_s15 = smov 128   ;;  %s3442_s16 = smov 8  }
  0x12   :  { %35 = dma.hbm_to_vmem [thread:$0]  %s3951_s4, 512, %s30_s28, [#allocation3], %s3441_s15, %s3441_s15, %s3442_s16  }
  0x13   :  { %s3443_s19 = smov [#allocation5]   ;;  %s3390_s23 = scalar_lea.hbm %s3953_s6, 2048 }
  0x14   :  { %s43_s20 = sshll.u32 %s3443_s19, 4  ;;  %p3391_p8 = scmp.ne.s32.totalorder %s3953_s6, %s3390_s23  ;;  %s44_s20 = int_to_ptr.vmem [resolvable:$true] %s43_s20 }
  0x15   :  { %p3394_p9 = scmp.lt.u32.totalorder %s3390_s23, %s3953_s6 }
  0x17   :  { %p3396_p10 = pnand %p3394_p9, %p3391_p8 }
  0x19   :  { %3399 = shalt.err (!%p3396_p10)
}
  0x1a   :  { %s3400_s29 = scalar_lea.vmem %s44_s20, 2048  ;;  %p3405_p12 = scmp.lt.s32.totalorder %s44_s20, %s44_s20 }
  0x1b   :  { %p3401_p11 = scmp.ne.s32.totalorder %s44_s20, %s3400_s29  ;;  %p3406_p13 = scmp.lt.s32.totalorder %s3400_s29, %s3400_s29 }
  0x1d   :  { %p3407_p0 = por %p3406_p13, %p3405_p12 }
  0x1f   :  { %p3408_p1 = pnand %p3407_p0, %p3401_p11 }
  0x21   :  { %3411 = shalt.err (!%p3408_p1)
}
  0x22   :  { %49 = dma.hbm_to_vmem [thread:$0]  %s3953_s6, 2048, %s44_s20, [#allocation6], %s3441_s15, %s3441_s15, %s3442_s16  }
  0x23   :  { %3434 = dma.done.wait [#allocation3], 512  }
  0x24   :  { %3435 = vsyncadd [#allocation3], 4294966784 }
  0x25   :  { %3436 = dma.done.wait [#allocation6], 2048  }
  0x26   :  { %3437 = vsyncadd [#allocation6], 4294965248  ;;  %v3444_v0 = vmov 0.0|0.0   ;;  %vm3445_vm0 = vmmov 0   ;;  %v3446_v1 = vmov 0.0   ;;  %vm71_vm1 = vcmask 269312  }
  0x27   :  { %3048 = vmatprep.subr.bf16.mxu1 %v3444_v0  ;;  %2759 = vmatprep.mubr.msk.f32.mxu1 %vm3445_vm0, %v3446_v1  ;;  %v66_v2 = vld [vmem:[%s3948_s1] sm:$0xff]  ;;  %v67_v3 = vld [vmem:[%s3948_s1 + $0x8] sm:$0xff]  ;;  %v68_v4 = vld [vmem:[%s3948_s1 + $0x10] sm:$0xff]  ;;  %vm96_vm2 = vcmask 1040384   ;;  %s3448_s15 = smov 32   ;;  %vm224_vm3 = vcmask 261120  }
  0x28   :  { %v3028_v5 = vpack.c.bf16 %v67_v3, %v66_v2  ;;  %v69_v6 = vld [vmem:[%s3948_s1 + $0x18] sm:$0xff]  ;;  %v58_v7 = vld [vmem:[%s3947_s0] sm:$0xff]  ;;  %v214_v11 = vld [vmem:[#allocation2 + $0x8] sm:$0xff]  ;;  %vm2393_vm4 = vcmask 523264   ;;  %vm2395_vm5 = vcmask 785408   ;;  %s3450_s26 = smov [#allocation7]  }
  0x29   :  { %v3032_v8 = vpack.c.bf16 %v69_v6, %v68_v4  ;;  %2717 = vmatprep.mubr.msk.f32.mxu0 %vm71_vm1, %v58_v7  ;;  %v70_v9 = vld [vmem:[%s3948_s1 + $0x20] sm:$0x1]  ;;  %v59_v12 = vld [vmem:[%s3947_s0 + $0x8] sm:$0xff]  ;;  %v60_v14 = vld [vmem:[%s3947_s0 + $0x10] sm:$0xff]  ;;  %s2498_s27 = sshll.u32 %s3450_s26, 4  ;;  %s2499_s27 = int_to_ptr.vmem [resolvable:$true] %s2498_s27 }
  0x2a   :  { %3029 = vmatprep.subr.bf16.mxu0 %v3028_v5  ;;  %v213_v10 = vld [vmem:[#allocation2] sm:$0xff]  ;;  %v215_v15 = vld [vmem:[#allocation2 + $0x10] sm:$0xff]  ;;  %v216_v16 = vld [vmem:[#allocation2 + $0x18] sm:$0xff]  ;;  %s3412_s29 = scalar_lea.vmem %s2499_s27, 128  ;;  %p3417_p3 = scmp.lt.s32.totalorder %s2499_s27, %s2499_s27 }
  0x2b   :  { %3031 = vmatpush3.bf16.msra.mxu0 %v3028_v5  ;;  %v3545_v13 = vpack.c.bf16 %v214_v11, %v213_v10  ;;  %v61_v17 = vld [vmem:[%s3947_s0 + $0x18] sm:$0xff]  ;;  %v3557_v18 = vpack.c.bf16 %v216_v16, %v215_v15  ;;  %v62_v19 = vld [vmem:[%s3947_s0 + $0x20] sm:$0xff]  ;;  %v63_v20 = vld [vmem:[%s3947_s0 + $0x28] sm:$0xff]  ;;  %p3413_p2 = scmp.ne.s32.totalorder %s2499_s27, %s3412_s29  ;;  %p3418_p4 = scmp.lt.s32.totalorder %s3412_s29, %s3412_s29 }
  0x2c   :  { %3033 = vmatprep.subr.bf16.mxu0 %v3032_v8  ;;  %v64_v21 = vld [vmem:[%s3947_s0 + $0x30] sm:$0xff]  ;;  %v65_v22 = vld [vmem:[%s3947_s0 + $0x38] sm:$0xff]  ;;  %v205_v23 = vld [vmem:[%s3949_s2] sm:$0xff] }
  0x2d   :  { %v206_v24 = vld [vmem:[%s3949_s2 + $0x8] sm:$0xff]  ;;  %v207_v26 = vld [vmem:[%s3949_s2 + $0x10] sm:$0xff]  ;;  %v208_v27 = vld [vmem:[%s3949_s2 + $0x18] sm:$0xff]  ;;  %s3447_s2 = smov 64   ;;  %p3419_p5 = por %p3418_p4, %p3417_p3 }
  0x2e   :  { %v3587_v25 = vpack.c.bf16 %v206_v24, %v205_v23  ;;  %v3597_v28 = vpack.c.bf16 %v208_v27, %v207_v26  ;;  %v209_v52 = vld [vmem:[%s3950_s3] sm:$0xff]  ;;  %v210_v53 = vld [vmem:[%s3950_s3 + $0x8] sm:$0xff]  ;;  %v211_v54 = vld [vmem:[%s3950_s3 + $0x10] sm:$0xff] }
  0x2f   :  { %3035 = vmatpush3.bf16.msra.mxu0 %v3032_v8  ;;  %v3639_v55 = vpack.c.bf16 %v210_v53, %v209_v52  ;;  %v212_v56 = vld [vmem:[%s3950_s3 + $0x18] sm:$0xff]  ;;  %v3669_v62 = vld [vmem:[%s3952_s5] ss:$0 sm:$0xff]  ;;  %s3449_s5 = smov 96   ;;  %p3420_p6 = pnand %p3419_p5, %p3413_p2 }
  0x30   :  { %2715 = vmatprep.subr.msk.mxu0 %vm96_vm2, %v70_v9  ;;  %v3645_v57 = vpack.c.bf16 %v212_v56, %v211_v54 }
  0x31   :  { %3050 = vmatpush3.bf16.msra.mxu1 %v3639_v55 }
  0x32   :  { %3051 = vmatprep.subr.bf16.mxu1 %v3444_v0 }
  0x33   :  { %2716 = vmatpush3.msk.msra.mxu0 %vm96_vm2, %v70_v9 }
  0x34   :  { %2718 = vmatmul.mubr.msk.f32.vlgmr.msra.gmra.mrb[0].mxu0 %vm71_vm1, %v59_v12  ;;  %3036 = vmatprep.subr.bf16.mxu0 %v3444_v0 }
  0x35   :  { %3038 = vmatpush3.bf16.msra.mxu0 %v3545_v13  ;;  %2720 = vmatprep.mubr.msk.f32.mxu0 %vm71_vm1, %v60_v14 }
  0x36   :  { %3039 = vmatprep.subr.bf16.mxu0 %v3444_v0  ;;  %3053 = vmatpush3.bf16.msra.mxu1 %v3645_v57 }
  0x37   :  { %3060 = vmatprep.subr.bf16.mxu1 %v3444_v0 }
  0x38   :  { %2721 = vmatmul.mubr.msk.f32.gmra.mrb[2].mxu0 %vm71_vm1, %v61_v17 }
  0x39   :  { %2723 = vmatprep.mubr.msk.f32.mxu0 %vm71_vm1, %v62_v19  ;;  %3041 = vmatpush3.bf16.msra.mxu0 %v3557_v18 }
  0x3a   :  { %3042 = vmatprep.subr.bf16.mxu0 %v3444_v0 }
  0x3c   :  { %2724 = vmatmul.mubr.msk.f32.gmra.mrb[4].mxu0 %vm71_vm1, %v63_v20 }
  0x3d   :  { %2726 = vmatprep.mubr.msk.f32.mxu0 %vm71_vm1, %v64_v21 }
  0x40   :  { %2727 = vmatmul.mubr.msk.f32.gmra.mrb[6].mxu0 %vm71_vm1, %v65_v22 }
  0x41   :  { %2737 = vmatprep.mubr.msk.f32.mxu0 %vm3445_vm0, %v3446_v1 }
  0x44   :  { %2738 = vmatmul.mubr.f32.vlgmr.msra.gmra.mrb[8].mxu0 %v3446_v1 }
  0x45   :  { %3044 = vmatpush3.bf16.msra.mxu0 %v3587_v25  ;;  %2748 = vmatprep.mubr.msk.f32.mxu0 %vm3445_vm0, %v3446_v1 }
  0x46   :  { %3045 = vmatprep.subr.bf16.mxu0 %v3444_v0 }
  0x49   :  { %3047 = vmatpush3.bf16.msra.mxu0 %v3597_v28 }
  0x4a   :  { %3054 = vmatprep.subr.bf16.mxu0 %v3444_v0 }
  0x4c   :  { %2749 = vmatmul.mubr.f32.vlgmr.msra.gmra.mrb[10].mxu0 %v3446_v1 }
  0x4d   :  { %3056 = vmatpush3.bf16.msra.mxu0 %v3545_v13  ;;  %2770 = vmatprep.mubr.msk.f32.mxu0 %vm3445_vm0, %v3446_v1 }
  0x4e   :  { %3057 = vmatprep.subr.bf16.mxu0 %v3444_v0 }
  0x51   :  { %3059 = vmatpush3.bf16.msra.mxu0 %v3557_v18 }
  0x52   :  { %3066 = vmatprep.subr.bf16.mxu0 %v3444_v0 }
 0x107   :  { %v3611_v29 = vpop.f32.mrb[0].mxu0 }
 0x108   :  { %v166_v30 = vpop.f32.mrb[1].mxu0 }
 0x10b   :  { %v3613_v31 = vpop.f32.mrb[2].mxu0 }
 0x10c   :  { %v3615_v32 = vpop.f32.mrb[3].mxu0 }
 0x10f   :  { %v3617_v33 = vpop.f32.mrb[4].mxu0 }
 0x110   :  { %v3619_v34 = vpop.f32.mrb[5].mxu0 }
 0x113   :  { %v3621_v35 = vpop.f32.mrb[6].mxu0 }
 0x114   :  { %v3623_v36 = vpop.f32.mrb[7].mxu0 }
 0x117   :  { %v294_v37 = vpop.f32.mrb[8].mxu0 }
 0x118   :  { %v2739_v38 = vpop.f32.mrb[9].mxu0  ;;  %v295_v63 = vadd.f32 %v3669_v62, %v294_v37 }
 0x11f   :  { %v364_v39 = vpop.f32.mrb[10].mxu0 }
 0x120   :  { %v368_v40 = vadd.f32 %v364_v39, %v166_v30  ;;  %v2750_v41 = vpop.f32.mrb[11].mxu0 }
 0x122   :  { %3238 = vtanh.f32 %v368_v40  ;;  %v2518_v43 = vmul.f32 -1.442695, %v368_v40 }
 0x124   :  { %3240 = vpow2.f32 %v2518_v43 }
 0x12c   :  { %v3239_v42 = vpop.eup %3238 }
 0x12d   :  { %378 = vrot.lane.b32.xlu0 %v3239_v42, %s3447_s2 }
 0x12e   :  { %v3241_v44 = vpop.eup %3240 }
 0x12f   :  { %v372_v45 = vadd.f32 1.0, %v3241_v44 }
 0x131   :  { %3242 = vrcp.f32 %v372_v45 }
 0x13b   :  { %v3243_v46 = vpop.eup %3242 }
 0x13c   :  { %v376_v49 = vmul.f32 0.0, %v3243_v46 }
 0x19f   :  { %v379_v47 = vpop.permute.xlu0 %378 }
 0x1a0   :  { %v381_v48 = vmul.f32 %v3243_v46, %v379_v47 }
 0x1a2   :  { %383 = vrot.lane.b32.xlu0 %v381_v48, %s3448_s15 }
 0x214   :  { %v384_v50 = vpop.permute.xlu0 %383 }
 0x215   :  { %v3627_v51 = vadd.f32 %v384_v50, %v376_v49 }
 0x217   :  { %3244 = vtanh.f32 %v3627_v51 }
 0x221   :  { %v3245_v58 = vpop.eup %3244 }
 0x222   :  { %389 = vrot.lane.b32.xlu1 %v3245_v58, %s3447_s2 }
 0x294   :  { %v390_v59 = vpop.permute.xlu1 %389 }
 0x295   :  { %v392_v60 = vmul.f32 %v3243_v46, %v390_v59 }
 0x297   :  { %394 = vrot.lane.b32.xlu1 %v392_v60, %s3448_s15 }
 0x309   :  { %v395_v61 = vpop.permute.xlu1 %394 }
 0x30a   :  { %2760 = vmatmul.mubr.msk.f32.vlgmr.msra.gmra.mrb[0].mxu1 %vm224_vm3, %v395_v61 }
 0x30b   :  { %3062 = vmatpush3.bf16.msra.mxu1 %v3587_v25  ;;  %2781 = vmatprep.mubr.msk.f32.mxu1 %vm3445_vm0, %v3446_v1 }
 0x30c   :  { %3063 = vmatprep.subr.bf16.mxu1 %v3444_v0 }
 0x30f   :  { %3065 = vmatpush3.bf16.msra.mxu1 %v3597_v28 }
 0x310   :  { %3072 = vmatprep.subr.bf16.mxu1 %v3444_v0 }
 0x312   :  { %2782 = vmatmul.mubr.msk.f32.vlgmr.msra.gmra.mrb[2].mxu1 %vm224_vm3, %v395_v61 }
 0x313   :  { %3074 = vmatpush3.bf16.msra.mxu1 %v3545_v13  ;;  %2803 = vmatprep.mubr.msk.f32.mxu1 %vm3445_vm0, %v3446_v1 }
 0x314   :  { %3075 = vmatprep.subr.bf16.mxu1 %v3444_v0 }
 0x317   :  { %3077 = vmatpush3.bf16.msra.mxu1 %v3557_v18 }
 0x318   :  { %3084 = vmatprep.subr.bf16.mxu1 %v3444_v0 }
 0x3dd   :  { %v464_v2 = vpop.f32.mrb[0].mxu1 }
 0x3de   :  { %v468_v3 = vadd.f32 %v464_v2, %v295_v63  ;;  %v2761_v4 = vpop.f32.mrb[1].mxu1 }
 0x3e0   :  { %3246 = vtanh.f32 %v468_v3  ;;  %v2520_v10 = vmul.f32 -1.442695, %v468_v3 }
 0x3e5   :  { %v634_v5 = vpop.f32.mrb[2].mxu1 }
 0x3e6   :  { %v638_v6 = vadd.f32 %v3611_v29, %v634_v5  ;;  %v2783_v7 = vpop.f32.mrb[3].mxu1 }
 0x3e8   :  { %3248 = vtanh.f32 %v638_v6  ;;  %v2523_v11 = vmul.f32 -1.442695, %v638_v6 }
 0x3e9   :  { %3250 = vpow2.f32 %v2520_v10 }
 0x3ea   :  { %v3247_v8 = vpop.eup %3246  ;;  %3252 = vpow2.f32 %v2523_v11 }
 0x3eb   :  { %478 = vrot.lane.b32.xlu0 %v3247_v8, %s3447_s2 }
 0x3f2   :  { %v3249_v9 = vpop.eup %3248 }
 0x3f3   :  { %648 = vrot.lane.b32.xlu1 %v3249_v9, %s3447_s2  ;;  %v3251_v12 = vpop.eup %3250 }
 0x3f4   :  { %v472_v14 = vadd.f32 1.0, %v3251_v12  ;;  %v3253_v15 = vpop.eup %3252 }
 0x3f5   :  { %v642_v16 = vadd.f32 1.0, %v3253_v15 }
 0x3f6   :  { %3254 = vrcp.f32 %v472_v14 }
 0x3f7   :  { %3256 = vrcp.f32 %v642_v16 }
 0x400   :  { %v3255_v17 = vpop.eup %3254 }
 0x401   :  { %v3257_v21 = vpop.eup %3256  ;;  %v476_v24 = vmul.f32 0.0, %v3255_v17 }
 0x402   :  { %v646_v29 = vmul.f32 %v3257_v21, %v3627_v51 }
 0x45d   :  { %v479_v19 = vpop.permute.xlu0 %478 }
 0x45e   :  { %v481_v20 = vmul.f32 %v3255_v17, %v479_v19 }
 0x460   :  { %483 = vrot.lane.b32.xlu0 %v481_v20, %s3448_s15 }
 0x465   :  { %v649_v22 = vpop.permute.xlu1 %648 }
 0x466   :  { %v651_v23 = vmul.f32 %v3257_v21, %v649_v22 }
 0x468   :  { %653 = vrot.lane.b32.xlu1 %v651_v23, %s3448_s15 }
 0x4d2   :  { %v484_v26 = vpop.permute.xlu0 %483 }
 0x4d3   :  { %v3677_v27 = vadd.f32 %v484_v26, %v476_v24 }
 0x4d5   :  { %3258 = vtanh.f32 %v3677_v27 }
 0x4da   :  { %v654_v30 = vpop.permute.xlu1 %653 }
 0x4db   :  { %v3681_v37 = vadd.f32 %v654_v30, %v646_v29 }
 0x4dd   :  { %3260 = vtanh.f32 %v3681_v37 }
 0x4df   :  { %v3259_v38 = vpop.eup %3258 }
 0x4e0   :  { %489 = vrot.lane.b32.xlu0 %v3259_v38, %s3447_s2 }
 0x4e7   :  { %v3261_v39 = vpop.eup %3260 }
 0x4e8   :  { %659 = vrot.lane.b32.xlu1 %v3261_v39, %s3447_s2 }
 0x552   :  { %v490_v40 = vpop.permute.xlu0 %489 }
 0x553   :  { %v492_v41 = vmul.f32 %v3255_v17, %v490_v40 }
 0x555   :  { %494 = vrot.lane.b32.xlu0 %v492_v41, %s3448_s15 }
 0x55a   :  { %v660_v42 = vpop.permute.xlu1 %659 }
 0x55b   :  { %v662_v43 = vmul.f32 %v3257_v21, %v660_v42 }
 0x55d   :  { %664 = vrot.lane.b32.xlu1 %v662_v43, %s3448_s15 }
 0x5c7   :  { %v495_v44 = vpop.permute.xlu0 %494 }
 0x5c8   :  { %2771 = vmatmul.mubr.msk.f32.vlgmr.msra.gmra.mrb[12].mxu0 %vm224_vm3, %v495_v44 }
 0x5c9   :  { %3068 = vmatpush3.bf16.msra.mxu0 %v3639_v55  ;;  %2792 = vmatprep.mubr.msk.f32.mxu0 %vm3445_vm0, %v3446_v1 }
 0x5ca   :  { %3069 = vmatprep.subr.bf16.mxu0 %v3444_v0 }
 0x5cd   :  { %3071 = vmatpush3.bf16.msra.mxu0 %v3645_v57 }
 0x5ce   :  { %3078 = vmatprep.subr.bf16.mxu0 %v3444_v0 }
 0x5cf   :  { %v665_v45 = vpop.permute.xlu1 %664 }
 0x5d0   :  { %2793 = vmatmul.mubr.msk.f32.vlgmr.msra.gmra.mrb[12].mxu0 %vm224_vm3, %v665_v45 }
 0x5d1   :  { %3080 = vmatpush3.bf16.msra.mxu0 %v3587_v25  ;;  %2814 = vmatprep.mubr.msk.f32.mxu0 %vm3445_vm0, %v3446_v1 }
 0x5d2   :  { %3081 = vmatprep.subr.bf16.mxu0 %v3444_v0 }
 0x5d5   :  { %3083 = vmatpush3.bf16.msra.mxu0 %v3597_v28 }
 0x5d6   :  { %3090 = vmatprep.subr.bf16.mxu0 %v3444_v0 }
 0x5d8   :  { %2815 = vmatmul.mubr.msk.f32.vlgmr.msra.gmra.mrb[14].mxu0 %vm224_vm3, %v665_v45 }
 0x5d9   :  { %3092 = vmatpush3.bf16.msra.mxu0 %v3545_v13  ;;  %2836 = vmatprep.mubr.msk.f32.mxu0 %vm3445_vm0, %v3446_v1 }
 0x5da   :  { %3093 = vmatprep.subr.bf16.mxu0 %v3444_v0 }
 0x5dd   :  { %3095 = vmatpush3.bf16.msra.mxu0 %v3557_v18 }
 0x5de   :  { %3102 = vmatprep.subr.bf16.mxu0 %v3444_v0 }
 0x6a3   :  { %v734_v46 = vpop.f32.mrb[12].mxu0 }
 0x6a4   :  { %v3206_v47 = vadd.f32 %v3669_v62, %v734_v46  ;;  %v2794_v48 = vpop.f32.mrb[13].mxu0 }
 0x6a6   :  { %3262 = vtanh.f32 %v3206_v47  ;;  %v2525_v54 = vmul.f32 -1.442695, %v3206_v47 }
 0x6ab   :  { %v904_v49 = vpop.f32.mrb[14].mxu0 }
 0x6ac   :  { %v908_v50 = vadd.f32 %v904_v49, %v3615_v32  ;;  %v2816_v51 = vpop.f32.mrb[15].mxu0 }
 0x6ae   :  { %3264 = vtanh.f32 %v908_v50  ;;  %v2528_v56 = vmul.f32 -1.442695, %v908_v50 }
 0x6af   :  { %3266 = vpow2.f32 %v2525_v54 }
 0x6b0   :  { %v3263_v52 = vpop.eup %3262  ;;  %3268 = vpow2.f32 %v2528_v56 }
 0x6b1   :  { %748 = vrot.lane.b32.xlu0 %v3263_v52, %s3447_s2 }
 0x6b8   :  { %v3265_v53 = vpop.eup %3264 }
 0x6b9   :  { %918 = vrot.lane.b32.xlu1 %v3265_v53, %s3447_s2  ;;  %v3267_v58 = vpop.eup %3266 }
 0x6ba   :  { %v742_v59 = vadd.f32 1.0, %v3267_v58  ;;  %v3269_v60 = vpop.eup %3268 }
 0x6bb   :  { %v912_v61 = vadd.f32 1.0, %v3269_v60 }
 0x6bc   :  { %3270 = vrcp.f32 %v742_v59 }
 0x6bd   :  { %3272 = vrcp.f32 %v912_v61 }
 0x6c6   :  { %v3271_v63 = vpop.eup %3270 }
 0x6c7   :  { %v3273_v3 = vpop.eup %3272  ;;  %v746_v6 = vmul.f32 %v3271_v63, %v3677_v27 }
 0x6c8   :  { %v916_v9 = vmul.f32 %v3273_v3, %v3681_v37 }
 0x723   :  { %v749_v32 = vpop.permute.xlu0 %748 }
 0x724   :  { %v751_v2 = vmul.f32 %v3271_v63, %v749_v32 }
 0x726   :  { %753 = vrot.lane.b32.xlu0 %v751_v2, %s3448_s15 }
 0x72b   :  { %v919_v4 = vpop.permute.xlu1 %918 }
 0x72c   :  { %v921_v5 = vmul.f32 %v3273_v3, %v919_v4 }
 0x72e   :  { %923 = vrot.lane.b32.xlu1 %v921_v5, %s3448_s15 }
 0x798   :  { %v754_v7 = vpop.permute.xlu0 %753 }
 0x799   :  { %v3716_v8 = vadd.f32 %v754_v7, %v746_v6 }
 0x79b   :  { %3274 = vtanh.f32 %v3716_v8 }
 0x7a0   :  { %v924_v10 = vpop.permute.xlu1 %923 }
 0x7a1   :  { %v3720_v11 = vadd.f32 %v924_v10, %v916_v9 }
 0x7a3   :  { %3276 = vtanh.f32 %v3720_v11 }
 0x7a5   :  { %v3275_v12 = vpop.eup %3274 }
 0x7a6   :  { %759 = vrot.lane.b32.xlu0 %v3275_v12, %s3447_s2 }
 0x7ad   :  { %v3277_v14 = vpop.eup %3276 }
 0x7ae   :  { %929 = vrot.lane.b32.xlu1 %v3277_v14, %s3447_s2 }
 0x818   :  { %v760_v15 = vpop.permute.xlu0 %759 }
 0x819   :  { %v762_v16 = vmul.f32 %v3271_v63, %v760_v15 }
 0x81b   :  { %764 = vrot.lane.b32.xlu0 %v762_v16, %s3448_s15 }
 0x820   :  { %v930_v17 = vpop.permute.xlu1 %929 }
 0x821   :  { %v932_v19 = vmul.f32 %v3273_v3, %v930_v17 }
 0x823   :  { %934 = vrot.lane.b32.xlu1 %v932_v19, %s3448_s15 }
 0x88d   :  { %v765_v20 = vpop.permute.xlu0 %764 }
 0x88e   :  { %2804 = vmatmul.mubr.msk.f32.vlgmr.msra.gmra.mrb[4].mxu1 %vm224_vm3, %v765_v20 }
 0x88f   :  { %3086 = vmatpush3.bf16.msra.mxu1 %v3639_v55  ;;  %2825 = vmatprep.mubr.msk.f32.mxu1 %vm3445_vm0, %v3446_v1 }
 0x890   :  { %3087 = vmatprep.subr.bf16.mxu1 %v3444_v0 }
 0x893   :  { %3089 = vmatpush3.bf16.msra.mxu1 %v3645_v57 }
 0x894   :  { %3096 = vmatprep.subr.bf16.mxu1 %v3444_v0 }
 0x895   :  { %v935_v21 = vpop.permute.xlu1 %934 }
 0x896   :  { %2826 = vmatmul.mubr.msk.f32.vlgmr.msra.gmra.mrb[4].mxu1 %vm224_vm3, %v935_v21 }
 0x897   :  { %3098 = vmatpush3.bf16.msra.mxu1 %v3587_v25  ;;  %2847 = vmatprep.mubr.msk.f32.mxu1 %vm3445_vm0, %v3446_v1 }
 0x898   :  { %3099 = vmatprep.subr.bf16.mxu1 %v3444_v0 }
 0x89b   :  { %3101 = vmatpush3.bf16.msra.mxu1 %v3597_v28 }
 0x89c   :  { %3108 = vmatprep.subr.bf16.mxu1 %v3444_v0 }
 0x89e   :  { %2848 = vmatmul.mubr.msk.f32.vlgmr.msra.gmra.mrb[6].mxu1 %vm224_vm3, %v935_v21 }
 0x89f   :  { %3110 = vmatpush3.bf16.msra.mxu1 %v3545_v13  ;;  %2869 = vmatprep.mubr.msk.f32.mxu1 %vm3445_vm0, %v3446_v1 }
 0x8a0   :  { %3111 = vmatprep.subr.bf16.mxu1 %v3444_v0 }
 0x8a3   :  { %3113 = vmatpush3.bf16.msra.mxu1 %v3557_v18 }
 0x8a4   :  { %3120 = vmatprep.subr.bf16.mxu1 %v3444_v0 }
 0x969   :  { %v1004_v22 = vpop.f32.mrb[4].mxu1 }
 0x96a   :  { %v3207_v23 = vadd.f32 %v3669_v62, %v1004_v22  ;;  %v2827_v24 = vpop.f32.mrb[5].mxu1 }
 0x96c   :  { %3278 = vtanh.f32 %v3207_v23  ;;  %v2530_v38 = vmul.f32 -1.442695, %v3207_v23 }
 0x971   :  { %v1174_v26 = vpop.f32.mrb[6].mxu1 }
 0x972   :  { %v1178_v27 = vadd.f32 %v3613_v31, %v1174_v26  ;;  %v2849_v29 = vpop.f32.mrb[7].mxu1 }
 0x974   :  { %3280 = vtanh.f32 %v1178_v27  ;;  %v2533_v39 = vmul.f32 -1.442695, %v1178_v27 }
 0x975   :  { %3282 = vpow2.f32 %v2530_v38 }
 0x976   :  { %v3279_v30 = vpop.eup %3278  ;;  %3284 = vpow2.f32 %v2533_v39 }
 0x977   :  { %1018 = vrot.lane.b32.xlu0 %v3279_v30, %s3447_s2 }
 0x97e   :  { %v3281_v37 = vpop.eup %3280 }
 0x97f   :  { %1188 = vrot.lane.b32.xlu1 %v3281_v37, %s3447_s2  ;;  %v3283_v40 = vpop.eup %3282 }
 0x980   :  { %v1012_v41 = vadd.f32 1.0, %v3283_v40  ;;  %v3285_v42 = vpop.eup %3284 }
 0x981   :  { %v1182_v43 = vadd.f32 1.0, %v3285_v42 }
 0x982   :  { %3286 = vrcp.f32 %v1012_v41 }
 0x983   :  { %3288 = vrcp.f32 %v1182_v43 }
 0x98c   :  { %v3287_v44 = vpop.eup %3286 }
 0x98d   :  { %v3289_v46 = vpop.eup %3288  ;;  %v1016_v49 = vmul.f32 %v3287_v44, %v3716_v8 }
 0x98e   :  { %v1186_v52 = vmul.f32 %v3289_v46, %v3720_v11 }
 0x9e9   :  { %v1019_v31 = vpop.permute.xlu0 %1018 }
 0x9ea   :  { %v1021_v45 = vmul.f32 %v3287_v44, %v1019_v31 }
 0x9ec   :  { %1023 = vrot.lane.b32.xlu0 %v1021_v45, %s3448_s15 }
 0x9f1   :  { %v1189_v47 = vpop.permute.xlu1 %1188 }
 0x9f2   :  { %v1191_v48 = vmul.f32 %v3289_v46, %v1189_v47 }
 0x9f4   :  { %1193 = vrot.lane.b32.xlu1 %v1191_v48, %s3448_s15 }
 0xa5e   :  { %v1024_v50 = vpop.permute.xlu0 %1023 }
 0xa5f   :  { %v3755_v51 = vadd.f32 %v1024_v50, %v1016_v49 }
 0xa61   :  { %3290 = vtanh.f32 %v3755_v51 }
 0xa66   :  { %v1194_v53 = vpop.permute.xlu1 %1193 }
 0xa67   :  { %v3759_v54 = vadd.f32 %v1194_v53, %v1186_v52 }
 0xa69   :  { %3292 = vtanh.f32 %v3759_v54 }
 0xa6b   :  { %v3291_v56 = vpop.eup %3290 }
 0xa6c   :  { %1029 = vrot.lane.b32.xlu0 %v3291_v56, %s3447_s2 }
 0xa73   :  { %v3293_v58 = vpop.eup %3292 }
 0xa74   :  { %1199 = vrot.lane.b32.xlu1 %v3293_v58, %s3447_s2 }
 0xade   :  { %v1030_v59 = vpop.permute.xlu0 %1029 }
 0xadf   :  { %v1032_v60 = vmul.f32 %v3287_v44, %v1030_v59 }
 0xae1   :  { %1034 = vrot.lane.b32.xlu0 %v1032_v60, %s3448_s15 }
 0xae6   :  { %v1200_v61 = vpop.permute.xlu1 %1199 }
 0xae7   :  { %v1202_v63 = vmul.f32 %v3289_v46, %v1200_v61 }
 0xae9   :  { %1204 = vrot.lane.b32.xlu1 %v1202_v63, %s3448_s15 }
 0xb53   :  { %v1035_v32 = vpop.permute.xlu0 %1034 }
 0xb54   :  { %2837 = vmatmul.mubr.msk.f32.vlgmr.msra.gmra.mrb[16].mxu0 %vm224_vm3, %v1035_v32 }
 0xb55   :  { %3104 = vmatpush3.bf16.msra.mxu0 %v3639_v55  ;;  %2858 = vmatprep.mubr.msk.f32.mxu0 %vm3445_vm0, %v3446_v1 }
 0xb56   :  { %3105 = vmatprep.subr.bf16.mxu0 %v3444_v0 }
 0xb59   :  { %3107 = vmatpush3.bf16.msra.mxu0 %v3645_v57 }
 0xb5a   :  { %3114 = vmatprep.subr.bf16.mxu0 %v3444_v0 }
 0xb5b   :  { %v1205_v2 = vpop.permute.xlu1 %1204 }
 0xb5c   :  { %2859 = vmatmul.mubr.msk.f32.vlgmr.msra.gmra.mrb[16].mxu0 %vm224_vm3, %v1205_v2 }
 0xb5d   :  { %3116 = vmatpush3.bf16.msra.mxu0 %v3587_v25  ;;  %2880 = vmatprep.mubr.msk.f32.mxu0 %vm3445_vm0, %v3446_v1 }
 0xb5e   :  { %3117 = vmatprep.subr.bf16.mxu0 %v3444_v0 }
 0xb61   :  { %3119 = vmatpush3.bf16.msra.mxu0 %v3597_v28 }
 0xb62   :  { %3126 = vmatprep.subr.bf16.mxu0 %v3444_v0 }
 0xb64   :  { %2881 = vmatmul.mubr.msk.f32.vlgmr.msra.gmra.mrb[18].mxu0 %vm224_vm3, %v1205_v2 }
 0xb65   :  { %3128 = vmatpush3.bf16.msra.mxu0 %v3545_v13  ;;  %2902 = vmatprep.mubr.msk.f32.mxu0 %vm3445_vm0, %v3446_v1 }
 0xb66   :  { %3129 = vmatprep.subr.bf16.mxu0 %v3444_v0 }
 0xb69   :  { %3131 = vmatpush3.bf16.msra.mxu0 %v3557_v18 }
 0xb6a   :  { %3138 = vmatprep.subr.bf16.mxu0 %v3444_v0 }
 0xc2f   :  { %v1274_v3 = vpop.f32.mrb[16].mxu0 }
 0xc30   :  { %v3208_v4 = vadd.f32 %v3669_v62, %v1274_v3  ;;  %v2860_v5 = vpop.f32.mrb[17].mxu0 }
 0xc32   :  { %3294 = vtanh.f32 %v3208_v4  ;;  %v2535_v11 = vmul.f32 -1.442695, %v3208_v4 }
 0xc37   :  { %v1444_v6 = vpop.f32.mrb[18].mxu0 }
 0xc38   :  { %v1448_v7 = vadd.f32 %v1444_v6, %v3619_v34  ;;  %v2882_v8 = vpop.f32.mrb[19].mxu0 }
 0xc3a   :  { %3296 = vtanh.f32 %v1448_v7  ;;  %v2538_v12 = vmul.f32 -1.442695, %v1448_v7 }
 0xc3b   :  { %3298 = vpow2.f32 %v2535_v11 }
 0xc3c   :  { %v3295_v9 = vpop.eup %3294  ;;  %3300 = vpow2.f32 %v2538_v12 }
 0xc3d   :  { %1288 = vrot.lane.b32.xlu0 %v3295_v9, %s3447_s2 }
 0xc44   :  { %v3297_v10 = vpop.eup %3296 }
 0xc45   :  { %1458 = vrot.lane.b32.xlu1 %v3297_v10, %s3447_s2  ;;  %v3299_v14 = vpop.eup %3298 }
 0xc46   :  { %v1282_v15 = vadd.f32 1.0, %v3299_v14  ;;  %v3301_v16 = vpop.eup %3300 }
 0xc47   :  { %v1452_v17 = vadd.f32 1.0, %v3301_v16 }
 0xc48   :  { %3302 = vrcp.f32 %v1282_v15 }
 0xc49   :  { %3304 = vrcp.f32 %v1452_v17 }
 0xc52   :  { %v3303_v19 = vpop.eup %3302 }
 0xc53   :  { %v3305_v21 = vpop.eup %3304  ;;  %v1286_v24 = vmul.f32 %v3303_v19, %v3755_v51 }
 0xc54   :  { %v1456_v29 = vmul.f32 %v3305_v21, %v3759_v54 }
 0xcaf   :  { %v1289_v34 = vpop.permute.xlu0 %1288 }
 0xcb0   :  { %v1291_v20 = vmul.f32 %v3303_v19, %v1289_v34 }
 0xcb2   :  { %1293 = vrot.lane.b32.xlu0 %v1291_v20, %s3448_s15 }
 0xcb7   :  { %v1459_v22 = vpop.permute.xlu1 %1458 }
 0xcb8   :  { %v1461_v23 = vmul.f32 %v3305_v21, %v1459_v22 }
 0xcba   :  { %1463 = vrot.lane.b32.xlu1 %v1461_v23, %s3448_s15 }
 0xd24   :  { %v1294_v26 = vpop.permute.xlu0 %1293 }
 0xd25   :  { %v3794_v27 = vadd.f32 %v1294_v26, %v1286_v24 }
 0xd27   :  { %3306 = vtanh.f32 %v3794_v27 }
 0xd2c   :  { %v1464_v30 = vpop.permute.xlu1 %1463 }
 0xd2d   :  { %v3798_v37 = vadd.f32 %v1464_v30, %v1456_v29 }
 0xd2f   :  { %3308 = vtanh.f32 %v3798_v37 }
 0xd31   :  { %v3307_v38 = vpop.eup %3306 }
 0xd32   :  { %1299 = vrot.lane.b32.xlu0 %v3307_v38, %s3447_s2 }
 0xd39   :  { %v3309_v39 = vpop.eup %3308 }
 0xd3a   :  { %1469 = vrot.lane.b32.xlu1 %v3309_v39, %s3447_s2 }
 0xda4   :  { %v1300_v40 = vpop.permute.xlu0 %1299 }
 0xda5   :  { %v1302_v41 = vmul.f32 %v3303_v19, %v1300_v40 }
 0xda7   :  { %1304 = vrot.lane.b32.xlu0 %v1302_v41, %s3448_s15 }
 0xdac   :  { %v1470_v42 = vpop.permute.xlu1 %1469 }
 0xdad   :  { %v1472_v43 = vmul.f32 %v3305_v21, %v1470_v42 }
 0xdaf   :  { %1474 = vrot.lane.b32.xlu1 %v1472_v43, %s3448_s15 }
 0xe19   :  { %v1305_v44 = vpop.permute.xlu0 %1304 }
 0xe1a   :  { %2870 = vmatmul.mubr.msk.f32.vlgmr.msra.gmra.mrb[8].mxu1 %vm224_vm3, %v1305_v44 }
 0xe1b   :  { %3122 = vmatpush3.bf16.msra.mxu1 %v3639_v55  ;;  %2891 = vmatprep.mubr.msk.f32.mxu1 %vm3445_vm0, %v3446_v1 }
 0xe1c   :  { %3123 = vmatprep.subr.bf16.mxu1 %v3444_v0 }
 0xe1f   :  { %3125 = vmatpush3.bf16.msra.mxu1 %v3645_v57 }
 0xe20   :  { %3132 = vmatprep.subr.bf16.mxu1 %v3444_v0 }
 0xe21   :  { %v1475_v31 = vpop.permute.xlu1 %1474 }
 0xe22   :  { %2892 = vmatmul.mubr.msk.f32.vlgmr.msra.gmra.mrb[8].mxu1 %vm224_vm3, %v1475_v31 }
 0xe23   :  { %3134 = vmatpush3.bf16.msra.mxu1 %v3587_v25  ;;  %2913 = vmatprep.mubr.msk.f32.mxu1 %vm3445_vm0, %v3446_v1 }
 0xe24   :  { %3135 = vmatprep.subr.bf16.mxu1 %v3444_v0 }
 0xe27   :  { %3137 = vmatpush3.bf16.msra.mxu1 %v3597_v28 }
 0xe28   :  { %3144 = vmatprep.subr.bf16.mxu1 %v3444_v0 }
 0xe2a   :  { %2914 = vmatmul.mubr.msk.f32.vlgmr.msra.gmra.mrb[10].mxu1 %vm224_vm3, %v1475_v31 }
 0xe2b   :  { %3146 = vmatpush3.bf16.msra.mxu1 %v3545_v13  ;;  %2935 = vmatprep.mubr.msk.f32.mxu1 %vm3445_vm0, %v3446_v1 }
 0xe2c   :  { %3147 = vmatprep.subr.bf16.mxu1 %v3444_v0 }
 0xe2f   :  { %3149 = vmatpush3.bf16.msra.mxu1 %v3557_v18 }
 0xe30   :  { %3156 = vmatprep.subr.bf16.mxu1 %v3444_v0 }
 0xef5   :  { %v1544_v45 = vpop.f32.mrb[8].mxu1 }
 0xef6   :  { %v3209_v46 = vadd.f32 %v3669_v62, %v1544_v45  ;;  %v2893_v47 = vpop.f32.mrb[9].mxu1 }
 0xef8   :  { %3310 = vtanh.f32 %v3209_v46  ;;  %v2540_v53 = vmul.f32 -1.442695, %v3209_v46 }
 0xefd   :  { %v1714_v48 = vpop.f32.mrb[10].mxu1 }
 0xefe   :  { %v1718_v49 = vadd.f32 %v3617_v33, %v1714_v48  ;;  %v2915_v50 = vpop.f32.mrb[11].mxu1 }
 0xf00   :  { %3312 = vtanh.f32 %v1718_v49  ;;  %v2543_v54 = vmul.f32 -1.442695, %v1718_v49 }
 0xf01   :  { %3314 = vpow2.f32 %v2540_v53 }
 0xf02   :  { %v3311_v51 = vpop.eup %3310  ;;  %3316 = vpow2.f32 %v2543_v54 }
 0xf03   :  { %1558 = vrot.lane.b32.xlu0 %v3311_v51, %s3447_s2 }
 0xf0a   :  { %v3313_v52 = vpop.eup %3312 }
 0xf0b   :  { %1728 = vrot.lane.b32.xlu1 %v3313_v52, %s3447_s2  ;;  %v3315_v56 = vpop.eup %3314 }
 0xf0c   :  { %v1552_v58 = vadd.f32 1.0, %v3315_v56  ;;  %v3317_v59 = vpop.eup %3316 }
 0xf0d   :  { %v1722_v60 = vadd.f32 1.0, %v3317_v59 }
 0xf0e   :  { %3318 = vrcp.f32 %v1552_v58 }
 0xf0f   :  { %3320 = vrcp.f32 %v1722_v60 }
 0xf18   :  { %v3319_v61 = vpop.eup %3318 }
 0xf19   :  { %v3321_v32 = vpop.eup %3320  ;;  %v1556_v4 = vmul.f32 %v3319_v61, %v3794_v27 }
 0xf1a   :  { %v1726_v7 = vmul.f32 %v3321_v32, %v3798_v37 }
 0xf75   :  { %v1559_v33 = vpop.permute.xlu0 %1558 }
 0xf76   :  { %v1561_v63 = vmul.f32 %v3319_v61, %v1559_v33 }
 0xf78   :  { %1563 = vrot.lane.b32.xlu0 %v1561_v63, %s3448_s15 }
 0xf7d   :  { %v1729_v2 = vpop.permute.xlu1 %1728 }
 0xf7e   :  { %v1731_v3 = vmul.f32 %v3321_v32, %v1729_v2 }
 0xf80   :  { %1733 = vrot.lane.b32.xlu1 %v1731_v3, %s3448_s15 }
 0xfea   :  { %v1564_v5 = vpop.permute.xlu0 %1563 }
 0xfeb   :  { %v3833_v6 = vadd.f32 %v1564_v5, %v1556_v4 }
 0xfed   :  { %3322 = vtanh.f32 %v3833_v6 }
 0xff2   :  { %v1734_v8 = vpop.permute.xlu1 %1733 }
 0xff3   :  { %v3837_v9 = vadd.f32 %v1734_v8, %v1726_v7 }
 0xff5   :  { %3324 = vtanh.f32 %v3837_v9 }
 0xff7   :  { %v3323_v10 = vpop.eup %3322 }
 0xff8   :  { %1569 = vrot.lane.b32.xlu0 %v3323_v10, %s3447_s2 }
 0xfff   :  { %v3325_v11 = vpop.eup %3324 }
0x1000   :  { %1739 = vrot.lane.b32.xlu1 %v3325_v11, %s3447_s2 }
0x106a   :  { %v1570_v12 = vpop.permute.xlu0 %1569 }
0x106b   :  { %v1572_v14 = vmul.f32 %v3319_v61, %v1570_v12 }
0x106d   :  { %1574 = vrot.lane.b32.xlu0 %v1572_v14, %s3448_s15 }
0x1072   :  { %v1740_v15 = vpop.permute.xlu1 %1739 }
0x1073   :  { %v1742_v16 = vmul.f32 %v3321_v32, %v1740_v15 }
0x1075   :  { %1744 = vrot.lane.b32.xlu1 %v1742_v16, %s3448_s15 }
0x10df   :  { %v1575_v17 = vpop.permute.xlu0 %1574 }
0x10e0   :  { %2903 = vmatmul.mubr.msk.f32.vlgmr.msra.gmra.mrb[20].mxu0 %vm224_vm3, %v1575_v17 }
0x10e1   :  { %3140 = vmatpush3.bf16.msra.mxu0 %v3639_v55  ;;  %2924 = vmatprep.mubr.msk.f32.mxu0 %vm3445_vm0, %v3446_v1 }
0x10e2   :  { %3141 = vmatprep.subr.bf16.mxu0 %v3444_v0 }
0x10e5   :  { %3143 = vmatpush3.bf16.msra.mxu0 %v3645_v57 }
0x10e6   :  { %3150 = vmatprep.subr.bf16.mxu0 %v3444_v0 }
0x10e7   :  { %v1745_v19 = vpop.permute.xlu1 %1744 }
0x10e8   :  { %2925 = vmatmul.mubr.msk.f32.vlgmr.msra.gmra.mrb[20].mxu0 %vm224_vm3, %v1745_v19 }
0x10e9   :  { %3152 = vmatpush3.bf16.msra.mxu0 %v3587_v25  ;;  %2946 = vmatprep.mubr.msk.f32.mxu0 %vm3445_vm0, %v3446_v1 }
0x10ea   :  { %3153 = vmatprep.subr.bf16.mxu0 %v3444_v0 }
0x10ed   :  { %3155 = vmatpush3.bf16.msra.mxu0 %v3597_v28 }
0x10ee   :  { %3162 = vmatprep.subr.bf16.mxu0 %v3444_v0 }
0x10f0   :  { %2947 = vmatmul.mubr.msk.f32.vlgmr.msra.gmra.mrb[22].mxu0 %vm224_vm3, %v1745_v19 }
0x10f1   :  { %3164 = vmatpush3.bf16.msra.mxu0 %v3545_v13  ;;  %2968 = vmatprep.mubr.msk.f32.mxu0 %vm3445_vm0, %v3446_v1 }
0x10f2   :  { %3165 = vmatprep.subr.bf16.mxu0 %v3444_v0 }
0x10f5   :  { %3167 = vmatpush3.bf16.msra.mxu0 %v3557_v18 }
0x10f6   :  { %3174 = vmatprep.subr.bf16.mxu0 %v3444_v0 }
0x11bb   :  { %v1814_v34 = vpop.f32.mrb[20].mxu0 }
0x11bc   :  { %v3210_v20 = vadd.f32 %v3669_v62, %v1814_v34  ;;  %v2926_v21 = vpop.f32.mrb[21].mxu0 }
0x11be   :  { %3326 = vtanh.f32 %v3210_v20  ;;  %v2545_v27 = vmul.f32 -1.442695, %v3210_v20 }
0x11c3   :  { %v1984_v22 = vpop.f32.mrb[22].mxu0 }
0x11c4   :  { %v1988_v23 = vadd.f32 %v1984_v22, %v3623_v36  ;;  %v2948_v24 = vpop.f32.mrb[23].mxu0 }
0x11c6   :  { %3328 = vtanh.f32 %v1988_v23  ;;  %v2548_v18 = vmul.f32 -1.442695, %v1988_v23 }
0x11c7   :  { %3330 = vpow2.f32 %v2545_v27 }
0x11c8   :  { %v3327_v13 = vpop.eup %3326  ;;  %3332 = vpow2.f32 %v2548_v18 }
0x11c9   :  { %1828 = vrot.lane.b32.xlu0 %v3327_v13, %s3447_s2 }
0x11d0   :  { %v3329_v26 = vpop.eup %3328 }
0x11d1   :  { %1998 = vrot.lane.b32.xlu1 %v3329_v26, %s3447_s2  ;;  %v3331_v29 = vpop.eup %3330 }
0x11d2   :  { %v1822_v30 = vadd.f32 1.0, %v3331_v29  ;;  %v3333_v37 = vpop.eup %3332 }
0x11d3   :  { %v1992_v38 = vadd.f32 1.0, %v3333_v37 }
0x11d4   :  { %3334 = vrcp.f32 %v1822_v30 }
0x11d5   :  { %3336 = vrcp.f32 %v1992_v38 }
0x11de   :  { %v3335_v39 = vpop.eup %3334 }
0x11df   :  { %v3337_v41 = vpop.eup %3336  ;;  %v1826_v44 = vmul.f32 %v3335_v39, %v3833_v6 }
0x11e0   :  { %v1996_v46 = vmul.f32 %v3337_v41, %v3837_v9 }
0x123b   :  { %v1829_v36 = vpop.permute.xlu0 %1828 }
0x123c   :  { %v1831_v40 = vmul.f32 %v3335_v39, %v1829_v36 }
0x123e   :  { %1833 = vrot.lane.b32.xlu0 %v1831_v40, %s3448_s15 }
0x1243   :  { %v1999_v42 = vpop.permute.xlu1 %1998 }
0x1244   :  { %v2001_v43 = vmul.f32 %v3337_v41, %v1999_v42 }
0x1246   :  { %2003 = vrot.lane.b32.xlu1 %v2001_v43, %s3448_s15  ;;  %v2398_v43 = vld [vmem:[#allocation5 + $0x8] sm:$0xff] }
0x12b0   :  { %v1834_v31 = vpop.permute.xlu0 %1833 }
0x12b1   :  { %v1836_v45 = vadd.f32 %v1834_v31, %v1826_v44  ;;  %v2399_v44 = vld [vmem:[#allocation5 + $0x10] sm:$0xff] }
0x12b3   :  { %3338 = vtanh.f32 %v1836_v45 }
0x12b8   :  { %v2004_v47 = vpop.permute.xlu1 %2003 }
0x12b9   :  { %v2006_v48 = vadd.f32 %v2004_v47, %v1996_v46  ;;  %v2401_v47 = vld [vmem:[#allocation5 + $0x20] sm:$0xff] }
0x12bb   :  { %3340 = vtanh.f32 %v2006_v48 }
0x12bd   :  { %v3339_v49 = vpop.eup %3338 }
0x12be   :  { %1839 = vrot.lane.b32.xlu0 %v3339_v49, %s3447_s2 }
0x12c5   :  { %v3341_v50 = vpop.eup %3340 }
0x12c6   :  { %2009 = vrot.lane.b32.xlu1 %v3341_v50, %s3447_s2  ;;  %v2403_v50 = vld [vmem:[#allocation5 + $0x30] sm:$0xff] }
0x1330   :  { %v1840_v51 = vpop.permute.xlu0 %1839 }
0x1331   :  { %v1842_v52 = vmul.f32 %v3335_v39, %v1840_v51  ;;  %v2404_v51 = vld [vmem:[#allocation5 + $0x38] sm:$0xff] }
0x1333   :  { %1844 = vrot.lane.b32.xlu0 %v1842_v52, %s3448_s15 }
0x1338   :  { %v2010_v53 = vpop.permute.xlu1 %2009 }
0x1339   :  { %v2012_v54 = vmul.f32 %v3337_v41, %v2010_v53  ;;  %v3190_v53 = vpack.c.bf16 %v2404_v51, %v2403_v50 }
0x133b   :  { %2014 = vrot.lane.b32.xlu1 %v2012_v54, %s3448_s15  ;;  %v2405_v54 = vld [vmem:[#allocation5 + $0x40] sm:$0xff] }
0x13a5   :  { %v1845_v56 = vpop.permute.xlu0 %1844 }
0x13a6   :  { %2936 = vmatmul.mubr.msk.f32.vlgmr.msra.gmra.mrb[12].mxu1 %vm224_vm3, %v1845_v56  ;;  %v2406_v56 = vld [vmem:[#allocation5 + $0x48] sm:$0xff] }
0x13a7   :  { %3158 = vmatpush3.bf16.msra.mxu1 %v3639_v55  ;;  %2957 = vmatprep.mubr.msk.f32.mxu1 %vm3445_vm0, %v3446_v1 }
0x13a8   :  { %3159 = vmatprep.subr.bf16.mxu1 %v3444_v0 }
0x13ab   :  { %3161 = vmatpush3.bf16.msra.mxu1 %v3645_v57 }
0x13ac   :  { %3168 = vmatprep.subr.bf16.mxu1 %v3444_v0 }
0x13ad   :  { %v2015_v58 = vpop.permute.xlu1 %2014 }
0x13ae   :  { %2958 = vmatmul.mubr.msk.f32.vlgmr.msra.gmra.mrb[12].mxu1 %vm224_vm3, %v2015_v58 }
0x13af   :  { %3170 = vmatpush3.bf16.msra.mxu1 %v3587_v25  ;;  %2979 = vmatprep.mubr.msk.f32.mxu1 %vm3445_vm0, %v3446_v1 }
0x13b0   :  { %3171 = vmatprep.subr.bf16.mxu1 %v3444_v0 }
0x13b3   :  { %3173 = vmatpush3.bf16.msra.mxu1 %v3597_v28 }
0x13b4   :  { %3180 = vmatprep.subr.bf16.mxu1 %v3444_v0 }
0x13b6   :  { %2980 = vmatmul.mubr.msk.f32.vlgmr.msra.gmra.mrb[14].mxu1 %vm224_vm3, %v2015_v58  ;;  %v3193_v58 = vpack.c.bf16 %v2406_v56, %v2405_v54 }
0x13b7   :  { %3025 = vmatprep.mubr.msk.f32.mxu1 %vm3445_vm0, %v3446_v1 }
0x1481   :  { %v2084_v59 = vpop.f32.mrb[12].mxu1 }
0x1482   :  { %v3211_v60 = vadd.f32 %v3669_v62, %v2084_v59  ;;  %v2959_v61 = vpop.f32.mrb[13].mxu1  ;;  %v2407_v59 = vld [vmem:[#allocation5 + $0x50] sm:$0xff] }
0x1484   :  { %3342 = vtanh.f32 %v3211_v60  ;;  %v2550_v2 = vmul.f32 -1.442695, %v3211_v60  ;;  %v2408_v60 = vld [vmem:[#allocation5 + $0x58] sm:$0xff] }
0x1485   :  { %v3196_v61 = vpack.c.bf16 %v2408_v60, %v2407_v59 }
0x1489   :  { %v2254_v25 = vpop.f32.mrb[14].mxu1 }
0x148a   :  { %v2258_v33 = vadd.f32 %v3621_v35, %v2254_v25  ;;  %v2981_v63 = vpop.f32.mrb[15].mxu1  ;;  %v2409_v25 = vld [vmem:[#allocation5 + $0x60] sm:$0xff] }
0x148c   :  { %3344 = vtanh.f32 %v2258_v33  ;;  %v2553_v3 = vmul.f32 -1.442695, %v2258_v33  ;;  %v2410_v33 = vld [vmem:[#allocation5 + $0x68] sm:$0xff] }
0x148d   :  { %3346 = vpow2.f32 %v2550_v2  ;;  %v3199_v63 = vpack.c.bf16 %v2410_v33, %v2409_v25 }
0x148e   :  { %v3343_v32 = vpop.eup %3342  ;;  %3348 = vpow2.f32 %v2553_v3 }
0x148f   :  { %2098 = vrot.lane.b32.xlu0 %v3343_v32, %s3447_s2  ;;  %v2411_v32 = vld [vmem:[#allocation5 + $0x70] sm:$0xff] }
0x1496   :  { %v3345_v28 = vpop.eup %3344 }
0x1497   :  { %2268 = vrot.lane.b32.xlu1 %v3345_v28, %s3447_s2  ;;  %v3347_v4 = vpop.eup %3346  ;;  %v2412_v28 = vld [vmem:[#allocation5 + $0x78] sm:$0xff] }
0x1498   :  { %v2092_v5 = vadd.f32 1.0, %v3347_v4  ;;  %v3349_v6 = vpop.eup %3348  ;;  %v3202_v2 = vpack.c.bf16 %v2412_v28, %v2411_v32 }
0x1499   :  { %v2262_v7 = vadd.f32 1.0, %v3349_v6 }
0x149a   :  { %3350 = vrcp.f32 %v2092_v5 }
0x149b   :  { %3352 = vrcp.f32 %v2262_v7 }
0x14a4   :  { %v3351_v8 = vpop.eup %3350 }
0x14a5   :  { %v3353_v10 = vpop.eup %3352  ;;  %v2096_v14 = vmul.f32 %v3351_v8, %v1836_v45  ;;  %v2400_v45 = vld [vmem:[#allocation5 + $0x18] sm:$0xff] }
0x14a6   :  { %v2266_v17 = vmul.f32 %v3353_v10, %v2006_v48  ;;  %v3184_v46 = vpack.c.bf16 %v2400_v45, %v2399_v44  ;;  %v2402_v48 = vld [vmem:[#allocation5 + $0x28] sm:$0xff] }
0x14a7   :  { %v3187_v49 = vpack.c.bf16 %v2402_v48, %v2401_v47 }
0x1501   :  { %v2099_v35 = vpop.permute.xlu0 %2098 }
0x1502   :  { %v2101_v9 = vmul.f32 %v3351_v8, %v2099_v35 }
0x1504   :  { %2103 = vrot.lane.b32.xlu0 %v2101_v9, %s3448_s15 }
0x1509   :  { %v2269_v11 = vpop.permute.xlu1 %2268 }
0x150a   :  { %v2271_v12 = vmul.f32 %v3353_v10, %v2269_v11 }
0x150c   :  { %2273 = vrot.lane.b32.xlu1 %v2271_v12, %s3448_s15 }
0x1576   :  { %v2104_v15 = vpop.permute.xlu0 %2103 }
0x1577   :  { %v2106_v16 = vadd.f32 %v2104_v15, %v2096_v14 }
0x1579   :  { %3354 = vtanh.f32 %v2106_v16 }
0x157e   :  { %v2274_v19 = vpop.permute.xlu1 %2273 }
0x157f   :  { %v3900_v34 = vadd.f32 %v2274_v19, %v2266_v17 }
0x1581   :  { %3356 = vtanh.f32 %v3900_v34 }
0x1583   :  { %v3355_v20 = vpop.eup %3354 }
0x1584   :  { %2109 = vrot.lane.b32.xlu0 %v3355_v20, %s3447_s2 }
0x158b   :  { %v3357_v21 = vpop.eup %3356 }
0x158c   :  { %2279 = vrot.lane.b32.xlu1 %v3357_v21, %s3447_s2 }
0x15f6   :  { %v2110_v22 = vpop.permute.xlu0 %2109 }
0x15f7   :  { %v2112_v23 = vmul.f32 %v3351_v8, %v2110_v22 }
0x15f9   :  { %2114 = vrot.lane.b32.xlu0 %v2112_v23, %s3448_s15 }
0x15fe   :  { %v2280_v24 = vpop.permute.xlu1 %2279 }
0x15ff   :  { %v2282_v13 = vmul.f32 %v3353_v10, %v2280_v24 }
0x1601   :  { %2284 = vrot.lane.b32.xlu1 %v2282_v13, %s3448_s15 }
0x166b   :  { %v2115_v26 = vpop.permute.xlu0 %2114 }
0x166c   :  { %2969 = vmatmul.mubr.msk.f32.vlgmr.msra.gmra.mrb[24].mxu0 %vm224_vm3, %v2115_v26 }
0x166d   :  { %3176 = vmatpush3.bf16.msra.mxu0 %v3639_v55  ;;  %2990 = vmatprep.mubr.msk.f32.mxu0 %vm3445_vm0, %v3446_v1 }
0x166e   :  { %3177 = vmatprep.subr.bf16.mxu0 %v3444_v0 }
0x1671   :  { %3179 = vmatpush3.bf16.msra.mxu0 %v3645_v57 }
0x1673   :  { %v3913_v27 = vpop.permute.xlu1 %2284 }
0x1674   :  { %2991 = vmatmul.mubr.msk.f32.vlgmr.msra.gmra.mrb[24].mxu0 %vm224_vm3, %v3913_v27  ;;  %v2392_v5 = vsel %vm224_vm3, %v3913_v27, %v3900_v34 }
0x1747   :  { %v2354_v18 = vpop.f32.mrb[24].mxu0 }
0x1748   :  { %v3212_v29 = vadd.f32 %v3669_v62, %v2354_v18  ;;  %v2992_v30 = vpop.f32.mrb[25].mxu0  ;;  %v2397_v62 = vld [vmem:[#allocation5] sm:$0xff] }
0x1749   :  { %v3181_v31 = vpack.c.bf16 %v2398_v43, %v2397_v62 }
0x174a   :  { %3358 = vtanh.f32 %v3212_v29  ;;  %v2555_v55 = vmul.f32 -1.442695, %v3212_v29 }
0x174b   :  { %3182 = vmatpush3.bf16.msra.mxu1 %v3181_v31 }
0x174c   :  { %3360 = vpow2.f32 %v2555_v55  ;;  %3183 = vmatprep.subr.bf16.mxu1 %v3444_v0 }
0x174f   :  { %3185 = vmatpush3.bf16.msra.mxu1 %v3184_v46 }
0x1750   :  { %3186 = vmatprep.subr.bf16.mxu1 %v3444_v0 }
0x1753   :  { %3188 = vmatpush3.bf16.msra.mxu1 %v3187_v49 }
0x1754   :  { %v3359_v37 = vpop.eup %3358  ;;  %3189 = vmatprep.subr.bf16.mxu1 %v3444_v0 }
0x1755   :  { %2368 = vrot.lane.b32.xlu0 %v3359_v37, %s3447_s2 }
0x1756   :  { %v3361_v1 = vpop.eup %3360 }
0x1757   :  { %v2362_v38 = vadd.f32 1.0, %v3361_v1  ;;  %3191 = vmatpush3.bf16.msra.mxu1 %v3190_v53 }
0x1758   :  { %3192 = vmatprep.subr.bf16.mxu1 %v3444_v0 }
0x1759   :  { %3362 = vrcp.f32 %v2362_v38 }
0x175b   :  { %3194 = vmatpush3.bf16.msra.mxu1 %v3193_v58 }
0x175c   :  { %3195 = vmatprep.subr.bf16.mxu1 %v3444_v0 }
0x175f   :  { %3197 = vmatpush3.bf16.msra.mxu1 %v3196_v61 }
0x1760   :  { %3198 = vmatprep.subr.bf16.mxu1 %v3444_v0 }
0x1763   :  { %v3363_v39 = vpop.eup %3362  ;;  %3200 = vmatpush3.bf16.msra.mxu1 %v3199_v63 }
0x1764   :  { %v2366_v40 = vmul.f32 %v3363_v39, %v2106_v16  ;;  %3201 = vmatprep.subr.bf16.mxu1 %v3444_v0  ;;  %v2556_v0 = vld [vmem:[%s3954_s7] ss:$0 sm:$0xff] }
0x1767   :  { %3203 = vmatpush3.bf16.msra.mxu1 %v3202_v2 }
0x17c7   :  { %v2369_v57 = vpop.permute.xlu0 %2368 }
0x17c8   :  { %v2371_v36 = vmul.f32 %v3363_v39, %v2369_v57 }
0x17ca   :  { %2373 = vrot.lane.b32.xlu1 %v2371_v36, %s3448_s15 }
0x183c   :  { %v2374_v41 = vpop.permute.xlu1 %2373 }
0x183d   :  { %v2376_v42 = vadd.f32 %v2374_v41, %v2366_v40 }
0x183f   :  { %3364 = vtanh.f32 %v2376_v42 }
0x1849   :  { %v3365_v52 = vpop.eup %3364 }
0x184a   :  { %2379 = vrot.lane.b32.xlu0 %v3365_v52, %s3447_s2 }
0x184e   :  { %2389 = vrot.lane.b32.xlu0 %v2376_v42, %s3447_s2 }
0x18bc   :  { %v2380_v3 = vpop.permute.xlu0 %2379 }
0x18bd   :  { %v2382_v4 = vmul.f32 %v3363_v39, %v2380_v3 }
0x18bf   :  { %2385 = vrot.lane.b32.xlu1 %v2382_v4, %s3449_s5 }
0x18c0   :  { %v2390_v7 = vpop.permute.xlu0 %2389 }
0x1931   :  { %v2386_v6 = vpop.permute.xlu1 %2385 }
0x1932   :  { %v2394_v8 = vsel %vm2393_vm4, %v2392_v5, %v2386_v6 }
0x1933   :  { %v2396_v35 = vsel %vm2395_vm5, %v2394_v8, %v2390_v7 }
0x1934   :  { %3026 = vmatmul.mubr.f32.vlgmr.msra.gmra.mrb[16].mxu1 %v2396_v35 }
0x1a07   :  { %v2486_v9 = vpop.f32.mrb[16].mxu1 }
0x1a08   :  { %v2487_v10 = vadd.f32 %v2556_v0, %v2486_v9  ;;  %v3027_v11 = vpop.f32.mrb[17].mxu1 }
0x1a0a   :  { %3366 = vtanh.f32 %v2487_v10 }
0x1a14   :  { %v3367_v12 = vpop.eup %3366 }
0x1a15   :  { %2491 = vst [vmem:[#allocation7] sm:$0xff] %v3367_v12 }
0x1a16   :  { %3423 = shalt.err (!%p3420_p6)
}
0x1a17   :  { %s3424_s7 = scalar_lea.hbm %s3955_s8, 128 }
0x1a18   :  { %p3425_p7 = scmp.ne.s32.totalorder %s3955_s8, %s3424_s7  ;;  %p3428_p8 = scmp.lt.u32.totalorder %s3424_s7, %s3955_s8 }
0x1a1a   :  { %p3430_p9 = pnand %p3428_p8, %p3425_p7 }
0x1a1c   :  { %3433 = shalt.err (!%p3430_p9)
}
0x1a1d   :  { %2501 = dma.vmem_to_hbm [thread:$0]  %s2499_s27, 128, %s3955_s8, [#allocation4]  }
0x1a1e   :  { %3438 = dma.done.wait [#allocation4], 128  }
0x1a1f   :  { %3439 = vsyncadd [#allocation4], 4294967168 }
0x1a20   :  { %2505 = vsyncpa [#allocation3], 1 }
0x1a21   :  { %2506 = vsyncpa [#allocation6], 1 }
0x1a22   :  { %2507 = vsyncpa [#allocation4], 1 }

</bundles_post_ra>
